<compile_context>
chip_gen: v6e
topology: v6e:2x2x1
jax: 0.10.0
libtpu: 0.0.40
codegen_flags: <defaults>
</compile_context>

<pallas_src>
import numpy as np

import jax
import jax.numpy as jnp
from jax.experimental import pallas as pl
from jax.experimental.pallas import tpu as pltpu


# ----------------------------------------------------------------------------
# Host-side weight preprocessing (runs once, plain numpy)
# ----------------------------------------------------------------------------
def _toeplitz_weights(w, width):
    """(3, 3, Cin, Cout) conv weights -> (3, width*Cin, width*Cout) banded mats.

    T[dy, wj*Cin + ci, wp*Cout + co] = w[dy, wj - wp + 1, ci, co] if |wj-wp|<=1
    so a 3x3 same-padded conv of a row-flattened image A (H, W*Cin) is
        out = shift_dn(A) @ T[0] + A @ T[1] + shift_up(A) @ T[2] + bias_tile.
    Zero padding (width and height) is encoded by the band / shift structure.
    """
    w = np.asarray(w, np.float32)
    _, _, cin, cout = w.shape
    t = np.zeros((3, width * cin, width * cout), np.float32)
    for dy in range(3):
        for dx in range(3):
            for wp in range(width):
                wj = wp + dx - 1
                if 0 <= wj < width:
                    t[dy, wj * cin:(wj + 1) * cin,
                      wp * cout:(wp + 1) * cout] = w[dy, dx]
    return t


def _bias_tile(b, width):
    """Per-channel bias -> (1, width*Cout) row matching the flattened layout."""
    return np.tile(np.asarray(b, np.float32), width)[None, :]


def _shift_mats(h):
    """(2, H, H): [0] shifts rows down (row i <- row i-1), [1] shifts up."""
    return np.stack([np.eye(h, k=-1, dtype=np.float32),
                     np.eye(h, k=1, dtype=np.float32)])


def _conv_flops(batch, h, wcin, wcout):
    # 2 tiny shift matmuls (h,h)@(h,wcin) + 3 banded matmuls (h,wcin)@(wcin,wcout)
    return 2 * batch * (2 * h * h * wcin + 3 * h * wcin * wcout)


# ----------------------------------------------------------------------------
# Pallas kernels
# ----------------------------------------------------------------------------
def _make_trunk_kernel(H, Wf, n_res, res_scale):
    """Fused: sub_mean + head conv + n_res resblocks + final conv + skips."""

    def kernel(x_ref, subm_ref, s_ref, th_ref, bh_ref,
               tb_ref, bb_ref, tf_ref, bf_ref, o_ref):
        s_dn = s_ref[0]                       # (H, H)
        s_up = s_ref[1]

        def conv(a, t0, t1, t2, brow):
            a_dn = jnp.dot(s_dn, a, preferred_element_type=jnp.float32)
            a_up = jnp.dot(s_up, a, preferred_element_type=jnp.float32)
            acc = jnp.dot(a_dn, t0, preferred_element_type=jnp.float32)
            acc = acc + jnp.dot(a, t1, preferred_element_type=jnp.float32)
            acc = acc + jnp.dot(a_up, t2, preferred_element_type=jnp.float32)
            return acc + brow

        # sub_mean fused as an in-kernel add on the flattened input rows.
        x = x_ref[0] + subm_ref[...]                              # (H, W*3)

        skip = conv(x, th_ref[0], th_ref[1], th_ref[2], bh_ref[...])
        res = skip
        for r in range(n_res):
            k1, k2 = 2 * r, 2 * r + 1
            t = conv(res, tb_ref[k1, 0], tb_ref[k1, 1], tb_ref[k1, 2],
                     bb_ref[k1])
            t = jnp.maximum(t, 0.0)
            c2 = conv(t, tb_ref[k2, 0], tb_ref[k2, 1], tb_ref[k2, 2],
                      bb_ref[k2])
            res = c2 * res_scale + res
        res = conv(res, tf_ref[0], tf_ref[1], tf_ref[2], bf_ref[...]) + skip

        o_ref[...] = res.reshape(1, H, Wf)

    return kernel


def trunk_call(x_flat, subm, shift, t_head, b_head, t_body, b_body,
               t_final, b_final, *, res_scale):
    """x_flat: (B, H, W*3) -> (B, H, W*nf); everything else stays in VMEM."""
    B, H, Wcin = x_flat.shape
    Wf = t_head.shape[-1]
    n_body = t_body.shape[0]
    n_res = n_body // 2

    kernel = _make_trunk_kernel(H, Wf, n_res, float(res_scale))

    flops = (_conv_flops(B, H, Wcin, Wf)
             + (n_body + 1) * _conv_flops(B, H, Wf, Wf))
    bytes_accessed = 4 * int(x_flat.size + B * H * Wf + subm.size + shift.size
                             + t_head.size + b_head.size + t_body.size
                             + b_body.size + t_final.size + b_final.size)

    return pl.pallas_call(
        kernel,
        out_shape=jax.ShapeDtypeStruct((B, H, Wf), jnp.float32),
        grid=(B,),
        in_specs=[
            pl.BlockSpec((1, H, Wcin), lambda i: (i, 0, 0)),          # image
            pl.BlockSpec((1, Wcin), lambda i: (0, 0)),                # -mean
            pl.BlockSpec((2, H, H), lambda i: (0, 0, 0)),             # shifts
            pl.BlockSpec((3, Wcin, Wf), lambda i: (0, 0, 0)),         # head T
            pl.BlockSpec((1, Wf), lambda i: (0, 0)),                  # head b
            pl.BlockSpec((n_body, 3, Wf, Wf), lambda i: (0, 0, 0, 0)),  # body T
            pl.BlockSpec((n_body, 1, Wf), lambda i: (0, 0, 0)),       # body b
            pl.BlockSpec((3, Wf, Wf), lambda i: (0, 0, 0)),           # final T
            pl.BlockSpec((1, Wf), lambda i: (0, 0)),                  # final b
        ],
        out_specs=pl.BlockSpec((1, H, Wf), lambda i: (i, 0, 0)),
        compiler_params=pltpu.CompilerParams(
            dimension_semantics=("parallel",)),
        cost_estimate=pl.CostEstimate(flops=flops, transcendentals=0,
                                      bytes_accessed=bytes_accessed),
    )(x_flat, subm, shift, t_head, b_head, t_body, b_body, t_final, b_final)


def conv3x3_call(x_flat, shift, t, b_tile):
    """Single fused 3x3 conv (+bias) in the flattened-row layout."""
    B, H, Wcin = x_flat.shape
    Wcout = t.shape[-1]

    def kernel(x_ref, s_ref, t_ref, b_ref, o_ref):
        s_dn = s_ref[0]
        s_up = s_ref[1]
        a = x_ref[0]
        a_dn = jnp.dot(s_dn, a, preferred_element_type=jnp.float32)
        a_up = jnp.dot(s_up, a, preferred_element_type=jnp.float32)
        acc = jnp.dot(a_dn, t_ref[0], preferred_element_type=jnp.float32)
        acc = acc + jnp.dot(a, t_ref[1], preferred_element_type=jnp.float32)
        acc = acc + jnp.dot(a_up, t_ref[2], preferred_element_type=jnp.float32)
        acc = acc + b_ref[...]
        o_ref[...] = acc.reshape(1, H, Wcout)

    flops = _conv_flops(B, H, Wcin, Wcout)
    bytes_accessed = 4 * int(x_flat.size + B * H * Wcout + t.size
                             + b_tile.size + shift.size)

    return pl.pallas_call(
        kernel,
        out_shape=jax.ShapeDtypeStruct((B, H, Wcout), jnp.float32),
        grid=(B,),
        in_specs=[
            pl.BlockSpec((1, H, Wcin), lambda i: (i, 0, 0)),
            pl.BlockSpec((2, H, H), lambda i: (0, 0, 0)),
            pl.BlockSpec((3, Wcin, Wcout), lambda i: (0, 0, 0)),
            pl.BlockSpec((1, Wcout), lambda i: (0, 0)),
        ],
        out_specs=pl.BlockSpec((1, H, Wcout), lambda i: (i, 0, 0)),
        compiler_params=pltpu.CompilerParams(
            dimension_semantics=("parallel",)),
        cost_estimate=pl.CostEstimate(flops=flops, transcendentals=0,
                                      bytes_accessed=bytes_accessed),
    )(x_flat, shift, t, b_tile)


# ----------------------------------------------------------------------------
# JAX glue (layout-only ops)
# ----------------------------------------------------------------------------
def pixel_shuffle_flat(x, width, channels, r):
    """PixelShuffle on the flattened (B, H, W*C) layout; matches torch order."""
    B, H, _ = x.shape
    base = channels // (r * r)
    x = x.reshape(B, H, width, base, r, r)
    x = jnp.transpose(x, (0, 1, 4, 2, 5, 3))         # (B, H, r, W, r, base)
    return x.reshape(B, H * r, width * r * base)


def pixel_shuffle_nhwc(x, r):
    B, H, W, Crr = x.shape
    C = Crr // (r * r)
    x = x.reshape(B, H, W, C, r, r)
    x = jnp.transpose(x, (0, 1, 4, 2, 5, 3))
    return x.reshape(B, H * r, W * r, C)


# ----------------------------------------------------------------------------
# Parameter construction (deterministic, synthetic)
# ----------------------------------------------------------------------------
def conv_params(key, cin, cout, std=0.05):
    kw, kb = jax.random.split(key)
    w = jax.random.normal(kw, (3, 3, cin, cout), jnp.float32) * std
    b = jax.random.normal(kb, (cout,), jnp.float32) * std
    return w, b


def make_edsr_params(key, num_feature_maps, num_resblocks, rgb_range, rgb_mean):
    nf = num_feature_maps
    keys = jax.random.split(key, 4 + 2 * num_resblocks + 8)
    ki = iter(range(len(keys)))

    params = {}
    params["mean_bias"] = rgb_range * jnp.asarray(rgb_mean, jnp.float32)
    params["head"] = conv_params(keys[next(ki)], 3, nf)

    body = []
    for _ in range(num_resblocks):
        body.append(conv_params(keys[next(ki)], nf, nf))   # conv1
        body.append(conv_params(keys[next(ki)], nf, nf))   # conv2
    params["body"] = body
    params["final"] = conv_params(keys[next(ki)], nf, nf)

    ups = {}
    ups[2] = {"stages": [(conv_params(keys[next(ki)], nf, 4 * nf), 2)],
              "tail": conv_params(keys[next(ki)], nf, 3)}
    ups[3] = {"stages": [(conv_params(keys[next(ki)], nf, 9 * nf), 3)],
              "tail": conv_params(keys[next(ki)], nf, 3)}
    ups[4] = {"stages": [(conv_params(keys[next(ki)], nf, 4 * nf), 2),
                         (conv_params(keys[next(ki)], nf, 4 * nf), 2)],
              "tail": conv_params(keys[next(ki)], nf, 3)}
    params["upsamplers"] = ups
    return params


def prepare_edsr(params, H, W, scale, rgb_range, rgb_mean):
    """Build kernel-ready (Toeplitz / tiled) arrays for a given input size."""
    nf = params["head"][0].shape[-1]
    mean_vec = np.asarray(rgb_mean, np.float32) * float(rgb_range)

    prep = {"nf": nf}

    # ---- trunk -------------------------------------------------------------
    hw, hb = params["head"]
    prep["trunk_shift"] = jnp.asarray(_shift_mats(H))
    prep["subm"] = jnp.asarray(np.tile(-mean_vec, W)[None, :])     # sub_mean
    prep["t_head"] = jnp.asarray(_toeplitz_weights(hw, W))
    prep["b_head"] = jnp.asarray(_bias_tile(hb, W))
    prep["t_body"] = jnp.asarray(
        np.stack([_toeplitz_weights(w, W) for w, _ in params["body"]]))
    prep["b_body"] = jnp.asarray(
        np.stack([_bias_tile(b, W) for _, b in params["body"]]))
    fw, fb = params["final"]
    prep["t_final"] = jnp.asarray(_toeplitz_weights(fw, W))
    prep["b_final"] = jnp.asarray(_bias_tile(fb, W))

    # ---- upsampler for the requested scale ----------------------------------
    up = params["upsamplers"][scale]
    cur_h, cur_w = H, W
    stages = []
    for (w, b), r in up["stages"]:
        stages.append({
            "shift": jnp.asarray(_shift_mats(cur_h)),
            "T": jnp.asarray(_toeplitz_weights(w, cur_w)),
            "b": jnp.asarray(_bias_tile(b, cur_w)),
            "width": cur_w, "cout": int(w.shape[-1]), "r": r,
        })
        cur_h *= r
        cur_w *= r
    prep["stages"] = stages

    tw, tb = up["tail"]
    tb_eff = np.asarray(tb, np.float32) + mean_vec      # fold add_mean in bias
    prep["tail_shift"] = jnp.asarray(_shift_mats(cur_h))
    prep["t_tail"] = jnp.asarray(_toeplitz_weights(tw, cur_w))
    prep["b_tail"] = jnp.asarray(_bias_tile(tb_eff, cur_w))
    return prep


# ----------------------------------------------------------------------------
# EDSR forward (Pallas path)
# ----------------------------------------------------------------------------
def edsr_forward(x_nchw, prep, res_scale):
    B, C, H, W = x_nchw.shape
    x = jnp.transpose(x_nchw, (0, 2, 3, 1)).reshape(B, H, W * C)
    x = x.astype(jnp.float32)

    # Fused trunk: sub_mean + head + resblocks + final conv + skips.
    res = trunk_call(
        x, prep["subm"], prep["trunk_shift"],
        prep["t_head"], prep["b_head"],
        prep["t_body"], prep["b_body"],
        prep["t_final"], prep["b_final"],
        res_scale=res_scale)

    # Upsampler: (conv -> pixel shuffle)* then tail conv (add_mean folded in).
    for st in prep["stages"]:
        y = conv3x3_call(res, st["shift"], st["T"], st["b"])
        res = pixel_shuffle_flat(y, st["width"], st["cout"], st["r"])
    out = conv3x3_call(res, prep["tail_shift"], prep["t_tail"], prep["b_tail"])

    Ho = out.shape[1]
    Wo = out.shape[2] // 3
    return jnp.transpose(out.reshape(B, Ho, Wo, 3), (0, 3, 1, 2))


# ----------------------------------------------------------------------------
# Pure-JAX reference (for correctness cross-check)
# ----------------------------------------------------------------------------
def edsr_reference(x_nchw, params, scale, res_scale, rgb_range, rgb_mean):
    x = jnp.transpose(x_nchw, (0, 2, 3, 1)).astype(jnp.float32)   # NHWC
    mean = rgb_range * jnp.asarray(rgb_mean, jnp.float32)

    def conv(v, w, b):
        y = jax.lax.conv_general_dilated(
            v, w, window_strides=(1, 1), padding="SAME",
            dimension_numbers=("NHWC", "HWIO", "NHWC"),
            precision=jax.lax.Precision.HIGHEST)
        return y + b

    x = x - mean
    hw, hb = params["head"]
    x = conv(x, hw, hb)
    res = x
    n_res = len(params["body"]) // 2
    for r in range(n_res):
        w1, b1 = params["body"][2 * r]
        w2, b2 = params["body"][2 * r + 1]
        t = jnp.maximum(conv(res, w1, b1), 0.0)
        res = conv(t, w2, b2) * res_scale + res
    fw, fb = params["final"]
    res = conv(res, fw, fb) + x

    up = params["upsamplers"][scale]
    for (w, b), r in up["stages"]:
        res = conv(res, w, b)
        res = pixel_shuffle_nhwc(res, r)
    tw, tb = up["tail"]
    res = conv(res, tw, tb)
    res = res + mean
    return jnp.transpose(res, (0, 3, 1, 2))


# ----------------------------------------------------------------------------
if __name__ == "__main__":
    NUM_FEATURE_MAPS = 8
    NUM_RESBLOCKS = 2
    RES_SCALE = 0.1
    RGB_RANGE = 255.0
    RGB_MEAN = (0.4488, 0.4371, 0.4040)
    SCALE = 2

    key = jax.random.PRNGKey(0)
    k_params, k_x = jax.random.split(key)

    params = make_edsr_params(k_params, NUM_FEATURE_MAPS, NUM_RESBLOCKS,
                              RGB_RANGE, RGB_MEAN)

    B, H, W = 2, 16, 16
    x = jax.random.uniform(k_x, (B, 3, H, W), jnp.float32) * RGB_RANGE

    prep = prepare_edsr(params, H, W, SCALE, RGB_RANGE, RGB_MEAN)

    out = edsr_forward(x, prep, RES_SCALE)
    out = jax.block_until_ready(out)

    assert out.shape == (B, 3, H * SCALE, W * SCALE), out.shape
    assert out.dtype == jnp.float32

    # Cross-check the fused Pallas path against a plain-JAX reference.
    ref = edsr_reference(x, params, SCALE, RES_SCALE, RGB_RANGE, RGB_MEAN)
    ref = jax.block_until_ready(ref)
    np.testing.assert_allclose(np.asarray(out), np.asarray(ref),
                               rtol=2e-2, atol=2e-1)

    print("KERNEL_OK")
</pallas_src>

<mosaic_0001>
module attributes {stable_mosaic.version = 11 : i64} {
  func.func @kernel(%arg0: i32, %arg1: memref<1x16x48xf32, #tpu.memory_space<vmem>>, %arg2: memref<1x48xf32, #tpu.memory_space<vmem>>, %arg3: memref<2x16x16xf32, #tpu.memory_space<vmem>>, %arg4: memref<3x48x128xf32, #tpu.memory_space<vmem>>, %arg5: memref<1x128xf32, #tpu.memory_space<vmem>>, %arg6: memref<4x3x128x128xf32, #tpu.memory_space<vmem>>, %arg7: memref<4x1x128xf32, #tpu.memory_space<vmem>>, %arg8: memref<3x128x128xf32, #tpu.memory_space<vmem>>, %arg9: memref<1x128xf32, #tpu.memory_space<vmem>>, %arg10: memref<1x16x128xf32, #tpu.memory_space<vmem>>) attributes {dimension_semantics = [#tpu.dimension_semantics<parallel>], iteration_bounds = array<i64: 2>, scalar_prefetch = 0 : i64, scratch_operands = 0 : i64, tpu.core_type = #tpu.core_type<tc>, window_params = [{transform_indices = @transform_0, window_bounds = array<i64: 1, 16, 48>}, {pipeline_mode = #tpu.pipeline_mode<synchronous>, transform_indices = @transform_1, window_bounds = array<i64: 1, 48>}, {pipeline_mode = #tpu.pipeline_mode<synchronous>, transform_indices = @transform_2, window_bounds = array<i64: 2, 16, 16>}, {pipeline_mode = #tpu.pipeline_mode<synchronous>, transform_indices = @transform_3, window_bounds = array<i64: 3, 48, 128>}, {pipeline_mode = #tpu.pipeline_mode<synchronous>, transform_indices = @transform_4, window_bounds = array<i64: 1, 128>}, {pipeline_mode = #tpu.pipeline_mode<synchronous>, transform_indices = @transform_5, window_bounds = array<i64: 4, 3, 128, 128>}, {pipeline_mode = #tpu.pipeline_mode<synchronous>, transform_indices = @transform_6, window_bounds = array<i64: 4, 1, 128>}, {pipeline_mode = #tpu.pipeline_mode<synchronous>, transform_indices = @transform_7, window_bounds = array<i64: 3, 128, 128>}, {pipeline_mode = #tpu.pipeline_mode<synchronous>, transform_indices = @transform_8, window_bounds = array<i64: 1, 128>}, {transform_indices = @transform_9, window_bounds = array<i64: 1, 16, 128>}]} {
    %c0 = arith.constant 0 : index
    %c0_0 = arith.constant 0 : index
    %c0_1 = arith.constant 0 : index
    %0 = vector.load %arg3[%c0, %c0_0, %c0_1] : memref<2x16x16xf32, #tpu.memory_space<vmem>>, vector<1x16x16xf32>
    %1 = vector.shape_cast %0 : vector<1x16x16xf32> to vector<16x16xf32>
    %c1 = arith.constant 1 : index
    %c0_2 = arith.constant 0 : index
    %c0_3 = arith.constant 0 : index
    %2 = vector.load %arg3[%c1, %c0_2, %c0_3] : memref<2x16x16xf32, #tpu.memory_space<vmem>>, vector<1x16x16xf32>
    %3 = vector.shape_cast %2 : vector<1x16x16xf32> to vector<16x16xf32>
    %c0_4 = arith.constant 0 : index
    %c0_5 = arith.constant 0 : index
    %c0_6 = arith.constant 0 : index
    %4 = vector.load %arg1[%c0_4, %c0_5, %c0_6] : memref<1x16x48xf32, #tpu.memory_space<vmem>>, vector<1x16x48xf32>
    %5 = vector.shape_cast %4 : vector<1x16x48xf32> to vector<16x48xf32>
    %c0_7 = arith.constant 0 : index
    %c0_8 = arith.constant 0 : index
    %6 = vector.load %arg2[%c0_7, %c0_8] : memref<1x48xf32, #tpu.memory_space<vmem>>, vector<1x48xf32>
    %7 = vector.broadcast %6 : vector<1x48xf32> to vector<16x48xf32>
    %8 = arith.addf %5, %7 : vector<16x48xf32>
    %c0_9 = arith.constant 0 : index
    %c0_10 = arith.constant 0 : index
    %c0_11 = arith.constant 0 : index
    %9 = vector.load %arg4[%c0_9, %c0_10, %c0_11] : memref<3x48x128xf32, #tpu.memory_space<vmem>>, vector<1x48x128xf32>
    %10 = vector.shape_cast %9 : vector<1x48x128xf32> to vector<48x128xf32>
    %c1_12 = arith.constant 1 : index
    %c0_13 = arith.constant 0 : index
    %c0_14 = arith.constant 0 : index
    %11 = vector.load %arg4[%c1_12, %c0_13, %c0_14] : memref<3x48x128xf32, #tpu.memory_space<vmem>>, vector<1x48x128xf32>
    %12 = vector.shape_cast %11 : vector<1x48x128xf32> to vector<48x128xf32>
    %c2 = arith.constant 2 : index
    %c0_15 = arith.constant 0 : index
    %c0_16 = arith.constant 0 : index
    %13 = vector.load %arg4[%c2, %c0_15, %c0_16] : memref<3x48x128xf32, #tpu.memory_space<vmem>>, vector<1x48x128xf32>
    %14 = vector.shape_cast %13 : vector<1x48x128xf32> to vector<48x128xf32>
    %c0_17 = arith.constant 0 : index
    %c0_18 = arith.constant 0 : index
    %15 = vector.load %arg5[%c0_17, %c0_18] : memref<1x128xf32, #tpu.memory_space<vmem>>, vector<1x128xf32>
    %cst = arith.constant dense<0.000000e+00> : vector<16x48xf32>
    %16 = tpu.matmul %1, %8, %cst {dimension_numbers = #tpu.dot_dimension_numbers<[1], [0], [0], [1], [0, 0, 1, 1], [], []>} : vector<16x16xf32>, vector<16x48xf32>, vector<16x48xf32> -> vector<16x48xf32>
    %cst_19 = arith.constant dense<0.000000e+00> : vector<16x48xf32>
    %17 = tpu.matmul %3, %8, %cst_19 {dimension_numbers = #tpu.dot_dimension_numbers<[1], [0], [0], [1], [0, 0, 1, 1], [], []>} : vector<16x16xf32>, vector<16x48xf32>, vector<16x48xf32> -> vector<16x48xf32>
    %cst_20 = arith.constant dense<0.000000e+00> : vector<16x128xf32>
    %18 = tpu.matmul %16, %10, %cst_20 {dimension_numbers = #tpu.dot_dimension_numbers<[1], [0], [0], [1], [0, 0, 1, 1], [], []>} : vector<16x48xf32>, vector<48x128xf32>, vector<16x128xf32> -> vector<16x128xf32>
    %cst_21 = arith.constant dense<0.000000e+00> : vector<16x128xf32>
    %19 = tpu.matmul %8, %12, %cst_21 {dimension_numbers = #tpu.dot_dimension_numbers<[1], [0], [0], [1], [0, 0, 1, 1], [], []>} : vector<16x48xf32>, vector<48x128xf32>, vector<16x128xf32> -> vector<16x128xf32>
    %20 = arith.addf %18, %19 : vector<16x128xf32>
    %cst_22 = arith.constant dense<0.000000e+00> : vector<16x128xf32>
    %21 = tpu.matmul %17, %14, %cst_22 {dimension_numbers = #tpu.dot_dimension_numbers<[1], [0], [0], [1], [0, 0, 1, 1], [], []>} : vector<16x48xf32>, vector<48x128xf32>, vector<16x128xf32> -> vector<16x128xf32>
    %22 = arith.addf %20, %21 : vector<16x128xf32>
    %23 = vector.broadcast %15 : vector<1x128xf32> to vector<16x128xf32>
    %24 = arith.addf %22, %23 : vector<16x128xf32>
    %c0_23 = arith.constant 0 : index
    %c0_24 = arith.constant 0 : index
    %c0_25 = arith.constant 0 : index
    %c0_26 = arith.constant 0 : index
    %25 = vector.load %arg6[%c0_23, %c0_24, %c0_25, %c0_26] : memref<4x3x128x128xf32, #tpu.memory_space<vmem>>, vector<1x1x128x128xf32>
    %26 = vector.shape_cast %25 : vector<1x1x128x128xf32> to vector<128x128xf32>
    %c0_27 = arith.constant 0 : index
    %c1_28 = arith.constant 1 : index
    %c0_29 = arith.constant 0 : index
    %c0_30 = arith.constant 0 : index
    %27 = vector.load %arg6[%c0_27, %c1_28, %c0_29, %c0_30] : memref<4x3x128x128xf32, #tpu.memory_space<vmem>>, vector<1x1x128x128xf32>
    %28 = vector.shape_cast %27 : vector<1x1x128x128xf32> to vector<128x128xf32>
    %c0_31 = arith.constant 0 : index
    %c2_32 = arith.constant 2 : index
    %c0_33 = arith.constant 0 : index
    %c0_34 = arith.constant 0 : index
    %29 = vector.load %arg6[%c0_31, %c2_32, %c0_33, %c0_34] : memref<4x3x128x128xf32, #tpu.memory_space<vmem>>, vector<1x1x128x128xf32>
    %30 = vector.shape_cast %29 : vector<1x1x128x128xf32> to vector<128x128xf32>
    %c0_35 = arith.constant 0 : index
    %c0_36 = arith.constant 0 : index
    %c0_37 = arith.constant 0 : index
    %31 = vector.load %arg7[%c0_35, %c0_36, %c0_37] : memref<4x1x128xf32, #tpu.memory_space<vmem>>, vector<1x1x128xf32>
    %32 = vector.shape_cast %31 : vector<1x1x128xf32> to vector<1x128xf32>
    %cst_38 = arith.constant dense<0.000000e+00> : vector<16x128xf32>
    %33 = tpu.matmul %1, %24, %cst_38 {dimension_numbers = #tpu.dot_dimension_numbers<[1], [0], [0], [1], [0, 0, 1, 1], [], []>} : vector<16x16xf32>, vector<16x128xf32>, vector<16x128xf32> -> vector<16x128xf32>
    %cst_39 = arith.constant dense<0.000000e+00> : vector<16x128xf32>
    %34 = tpu.matmul %3, %24, %cst_39 {dimension_numbers = #tpu.dot_dimension_numbers<[1], [0], [0], [1], [0, 0, 1, 1], [], []>} : vector<16x16xf32>, vector<16x128xf32>, vector<16x128xf32> -> vector<16x128xf32>
    %cst_40 = arith.constant dense<0.000000e+00> : vector<16x128xf32>
    %35 = tpu.matmul %33, %26, %cst_40 {dimension_numbers = #tpu.dot_dimension_numbers<[1], [0], [0], [1], [0, 0, 1, 1], [], []>} : vector<16x128xf32>, vector<128x128xf32>, vector<16x128xf32> -> vector<16x128xf32>
    %cst_41 = arith.constant dense<0.000000e+00> : vector<16x128xf32>
    %36 = tpu.matmul %24, %28, %cst_41 {dimension_numbers = #tpu.dot_dimension_numbers<[1], [0], [0], [1], [0, 0, 1, 1], [], []>} : vector<16x128xf32>, vector<128x128xf32>, vector<16x128xf32> -> vector<16x128xf32>
    %37 = arith.addf %35, %36 : vector<16x128xf32>
    %cst_42 = arith.constant dense<0.000000e+00> : vector<16x128xf32>
    %38 = tpu.matmul %34, %30, %cst_42 {dimension_numbers = #tpu.dot_dimension_numbers<[1], [0], [0], [1], [0, 0, 1, 1], [], []>} : vector<16x128xf32>, vector<128x128xf32>, vector<16x128xf32> -> vector<16x128xf32>
    %39 = arith.addf %37, %38 : vector<16x128xf32>
    %40 = vector.broadcast %32 : vector<1x128xf32> to vector<16x128xf32>
    %41 = arith.addf %39, %40 : vector<16x128xf32>
    %cst_43 = arith.constant 0.000000e+00 : f32
    %42 = vector.broadcast %cst_43 : f32 to vector<16x128xf32>
    %43 = arith.maximumf %41, %42 : vector<16x128xf32>
    %c1_44 = arith.constant 1 : index
    %c0_45 = arith.constant 0 : index
    %c0_46 = arith.constant 0 : index
    %c0_47 = arith.constant 0 : index
    %44 = vector.load %arg6[%c1_44, %c0_45, %c0_46, %c0_47] : memref<4x3x128x128xf32, #tpu.memory_space<vmem>>, vector<1x1x128x128xf32>
    %45 = vector.shape_cast %44 : vector<1x1x128x128xf32> to vector<128x128xf32>
    %c1_48 = arith.constant 1 : index
    %c1_49 = arith.constant 1 : index
    %c0_50 = arith.constant 0 : index
    %c0_51 = arith.constant 0 : index
    %46 = vector.load %arg6[%c1_48, %c1_49, %c0_50, %c0_51] : memref<4x3x128x128xf32, #tpu.memory_space<vmem>>, vector<1x1x128x128xf32>
    %47 = vector.shape_cast %46 : vector<1x1x128x128xf32> to vector<128x128xf32>
    %c1_52 = arith.constant 1 : index
    %c2_53 = arith.constant 2 : index
    %c0_54 = arith.constant 0 : index
    %c0_55 = arith.constant 0 : index
    %48 = vector.load %arg6[%c1_52, %c2_53, %c0_54, %c0_55] : memref<4x3x128x128xf32, #tpu.memory_space<vmem>>, vector<1x1x128x128xf32>
    %49 = vector.shape_cast %48 : vector<1x1x128x128xf32> to vector<128x128xf32>
    %c1_56 = arith.constant 1 : index
    %c0_57 = arith.constant 0 : index
    %c0_58 = arith.constant 0 : index
    %50 = vector.load %arg7[%c1_56, %c0_57, %c0_58] : memref<4x1x128xf32, #tpu.memory_space<vmem>>, vector<1x1x128xf32>
    %51 = vector.shape_cast %50 : vector<1x1x128xf32> to vector<1x128xf32>
    %cst_59 = arith.constant dense<0.000000e+00> : vector<16x128xf32>
    %52 = tpu.matmul %1, %43, %cst_59 {dimension_numbers = #tpu.dot_dimension_numbers<[1], [0], [0], [1], [0, 0, 1, 1], [], []>} : vector<16x16xf32>, vector<16x128xf32>, vector<16x128xf32> -> vector<16x128xf32>
    %cst_60 = arith.constant dense<0.000000e+00> : vector<16x128xf32>
    %53 = tpu.matmul %3, %43, %cst_60 {dimension_numbers = #tpu.dot_dimension_numbers<[1], [0], [0], [1], [0, 0, 1, 1], [], []>} : vector<16x16xf32>, vector<16x128xf32>, vector<16x128xf32> -> vector<16x128xf32>
    %cst_61 = arith.constant dense<0.000000e+00> : vector<16x128xf32>
    %54 = tpu.matmul %52, %45, %cst_61 {dimension_numbers = #tpu.dot_dimension_numbers<[1], [0], [0], [1], [0, 0, 1, 1], [], []>} : vector<16x128xf32>, vector<128x128xf32>, vector<16x128xf32> -> vector<16x128xf32>
    %cst_62 = arith.constant dense<0.000000e+00> : vector<16x128xf32>
    %55 = tpu.matmul %43, %47, %cst_62 {dimension_numbers = #tpu.dot_dimension_numbers<[1], [0], [0], [1], [0, 0, 1, 1], [], []>} : vector<16x128xf32>, vector<128x128xf32>, vector<16x128xf32> -> vector<16x128xf32>
    %56 = arith.addf %54, %55 : vector<16x128xf32>
    %cst_63 = arith.constant dense<0.000000e+00> : vector<16x128xf32>
    %57 = tpu.matmul %53, %49, %cst_63 {dimension_numbers = #tpu.dot_dimension_numbers<[1], [0], [0], [1], [0, 0, 1, 1], [], []>} : vector<16x128xf32>, vector<128x128xf32>, vector<16x128xf32> -> vector<16x128xf32>
    %58 = arith.addf %56, %57 : vector<16x128xf32>
    %59 = vector.broadcast %51 : vector<1x128xf32> to vector<16x128xf32>
    %60 = arith.addf %58, %59 : vector<16x128xf32>
    %cst_64 = arith.constant 1.000000e-01 : f32
    %61 = vector.broadcast %cst_64 : f32 to vector<16x128xf32>
    %62 = arith.mulf %60, %61 : vector<16x128xf32>
    %63 = arith.addf %62, %24 : vector<16x128xf32>
    %c2_65 = arith.constant 2 : index
    %c0_66 = arith.constant 0 : index
    %c0_67 = arith.constant 0 : index
    %c0_68 = arith.constant 0 : index
    %64 = vector.load %arg6[%c2_65, %c0_66, %c0_67, %c0_68] : memref<4x3x128x128xf32, #tpu.memory_space<vmem>>, vector<1x1x128x128xf32>
    %65 = vector.shape_cast %64 : vector<1x1x128x128xf32> to vector<128x128xf32>
    %c2_69 = arith.constant 2 : index
    %c1_70 = arith.constant 1 : index
    %c0_71 = arith.constant 0 : index
    %c0_72 = arith.constant 0 : index
    %66 = vector.load %arg6[%c2_69, %c1_70, %c0_71, %c0_72] : memref<4x3x128x128xf32, #tpu.memory_space<vmem>>, vector<1x1x128x128xf32>
    %67 = vector.shape_cast %66 : vector<1x1x128x128xf32> to vector<128x128xf32>
    %c2_73 = arith.constant 2 : index
    %c2_74 = arith.constant 2 : index
    %c0_75 = arith.constant 0 : index
    %c0_76 = arith.constant 0 : index
    %68 = vector.load %arg6[%c2_73, %c2_74, %c0_75, %c0_76] : memref<4x3x128x128xf32, #tpu.memory_space<vmem>>, vector<1x1x128x128xf32>
    %69 = vector.shape_cast %68 : vector<1x1x128x128xf32> to vector<128x128xf32>
    %c2_77 = arith.constant 2 : index
    %c0_78 = arith.constant 0 : index
    %c0_79 = arith.constant 0 : index
    %70 = vector.load %arg7[%c2_77, %c0_78, %c0_79] : memref<4x1x128xf32, #tpu.memory_space<vmem>>, vector<1x1x128xf32>
    %71 = vector.shape_cast %70 : vector<1x1x128xf32> to vector<1x128xf32>
    %cst_80 = arith.constant dense<0.000000e+00> : vector<16x128xf32>
    %72 = tpu.matmul %1, %63, %cst_80 {dimension_numbers = #tpu.dot_dimension_numbers<[1], [0], [0], [1], [0, 0, 1, 1], [], []>} : vector<16x16xf32>, vector<16x128xf32>, vector<16x128xf32> -> vector<16x128xf32>
    %cst_81 = arith.constant dense<0.000000e+00> : vector<16x128xf32>
    %73 = tpu.matmul %3, %63, %cst_81 {dimension_numbers = #tpu.dot_dimension_numbers<[1], [0], [0], [1], [0, 0, 1, 1], [], []>} : vector<16x16xf32>, vector<16x128xf32>, vector<16x128xf32> -> vector<16x128xf32>
    %cst_82 = arith.constant dense<0.000000e+00> : vector<16x128xf32>
    %74 = tpu.matmul %72, %65, %cst_82 {dimension_numbers = #tpu.dot_dimension_numbers<[1], [0], [0], [1], [0, 0, 1, 1], [], []>} : vector<16x128xf32>, vector<128x128xf32>, vector<16x128xf32> -> vector<16x128xf32>
    %cst_83 = arith.constant dense<0.000000e+00> : vector<16x128xf32>
    %75 = tpu.matmul %63, %67, %cst_83 {dimension_numbers = #tpu.dot_dimension_numbers<[1], [0], [0], [1], [0, 0, 1, 1], [], []>} : vector<16x128xf32>, vector<128x128xf32>, vector<16x128xf32> -> vector<16x128xf32>
    %76 = arith.addf %74, %75 : vector<16x128xf32>
    %cst_84 = arith.constant dense<0.000000e+00> : vector<16x128xf32>
    %77 = tpu.matmul %73, %69, %cst_84 {dimension_numbers = #tpu.dot_dimension_numbers<[1], [0], [0], [1], [0, 0, 1, 1], [], []>} : vector<16x128xf32>, vector<128x128xf32>, vector<16x128xf32> -> vector<16x128xf32>
    %78 = arith.addf %76, %77 : vector<16x128xf32>
    %79 = vector.broadcast %71 : vector<1x128xf32> to vector<16x128xf32>
    %80 = arith.addf %78, %79 : vector<16x128xf32>
    %cst_85 = arith.constant 0.000000e+00 : f32
    %81 = vector.broadcast %cst_85 : f32 to vector<16x128xf32>
    %82 = arith.maximumf %80, %81 : vector<16x128xf32>
    %c3 = arith.constant 3 : index
    %c0_86 = arith.constant 0 : index
    %c0_87 = arith.constant 0 : index
    %c0_88 = arith.constant 0 : index
    %83 = vector.load %arg6[%c3, %c0_86, %c0_87, %c0_88] : memref<4x3x128x128xf32, #tpu.memory_space<vmem>>, vector<1x1x128x128xf32>
    %84 = vector.shape_cast %83 : vector<1x1x128x128xf32> to vector<128x128xf32>
    %c3_89 = arith.constant 3 : index
    %c1_90 = arith.constant 1 : index
    %c0_91 = arith.constant 0 : index
    %c0_92 = arith.constant 0 : index
    %85 = vector.load %arg6[%c3_89, %c1_90, %c0_91, %c0_92] : memref<4x3x128x128xf32, #tpu.memory_space<vmem>>, vector<1x1x128x128xf32>
    %86 = vector.shape_cast %85 : vector<1x1x128x128xf32> to vector<128x128xf32>
    %c3_93 = arith.constant 3 : index
    %c2_94 = arith.constant 2 : index
    %c0_95 = arith.constant 0 : index
    %c0_96 = arith.constant 0 : index
    %87 = vector.load %arg6[%c3_93, %c2_94, %c0_95, %c0_96] : memref<4x3x128x128xf32, #tpu.memory_space<vmem>>, vector<1x1x128x128xf32>
    %88 = vector.shape_cast %87 : vector<1x1x128x128xf32> to vector<128x128xf32>
    %c3_97 = arith.constant 3 : index
    %c0_98 = arith.constant 0 : index
    %c0_99 = arith.constant 0 : index
    %89 = vector.load %arg7[%c3_97, %c0_98, %c0_99] : memref<4x1x128xf32, #tpu.memory_space<vmem>>, vector<1x1x128xf32>
    %90 = vector.shape_cast %89 : vector<1x1x128xf32> to vector<1x128xf32>
    %cst_100 = arith.constant dense<0.000000e+00> : vector<16x128xf32>
    %91 = tpu.matmul %1, %82, %cst_100 {dimension_numbers = #tpu.dot_dimension_numbers<[1], [0], [0], [1], [0, 0, 1, 1], [], []>} : vector<16x16xf32>, vector<16x128xf32>, vector<16x128xf32> -> vector<16x128xf32>
    %cst_101 = arith.constant dense<0.000000e+00> : vector<16x128xf32>
    %92 = tpu.matmul %3, %82, %cst_101 {dimension_numbers = #tpu.dot_dimension_numbers<[1], [0], [0], [1], [0, 0, 1, 1], [], []>} : vector<16x16xf32>, vector<16x128xf32>, vector<16x128xf32> -> vector<16x128xf32>
    %cst_102 = arith.constant dense<0.000000e+00> : vector<16x128xf32>
    %93 = tpu.matmul %91, %84, %cst_102 {dimension_numbers = #tpu.dot_dimension_numbers<[1], [0], [0], [1], [0, 0, 1, 1], [], []>} : vector<16x128xf32>, vector<128x128xf32>, vector<16x128xf32> -> vector<16x128xf32>
    %cst_103 = arith.constant dense<0.000000e+00> : vector<16x128xf32>
    %94 = tpu.matmul %82, %86, %cst_103 {dimension_numbers = #tpu.dot_dimension_numbers<[1], [0], [0], [1], [0, 0, 1, 1], [], []>} : vector<16x128xf32>, vector<128x128xf32>, vector<16x128xf32> -> vector<16x128xf32>
    %95 = arith.addf %93, %94 : vector<16x128xf32>
    %cst_104 = arith.constant dense<0.000000e+00> : vector<16x128xf32>
    %96 = tpu.matmul %92, %88, %cst_104 {dimension_numbers = #tpu.dot_dimension_numbers<[1], [0], [0], [1], [0, 0, 1, 1], [], []>} : vector<16x128xf32>, vector<128x128xf32>, vector<16x128xf32> -> vector<16x128xf32>
    %97 = arith.addf %95, %96 : vector<16x128xf32>
    %98 = vector.broadcast %90 : vector<1x128xf32> to vector<16x128xf32>
    %99 = arith.addf %97, %98 : vector<16x128xf32>
    %cst_105 = arith.constant 1.000000e-01 : f32
    %100 = vector.broadcast %cst_105 : f32 to vector<16x128xf32>
    %101 = arith.mulf %99, %100 : vector<16x128xf32>
    %102 = arith.addf %101, %63 : vector<16x128xf32>
    %c0_106 = arith.constant 0 : index
    %c0_107 = arith.constant 0 : index
    %c0_108 = arith.constant 0 : index
    %103 = vector.load %arg8[%c0_106, %c0_107, %c0_108] : memref<3x128x128xf32, #tpu.memory_space<vmem>>, vector<1x128x128xf32>
    %104 = vector.shape_cast %103 : vector<1x128x128xf32> to vector<128x128xf32>
    %c1_109 = arith.constant 1 : index
    %c0_110 = arith.constant 0 : index
    %c0_111 = arith.constant 0 : index
    %105 = vector.load %arg8[%c1_109, %c0_110, %c0_111] : memref<3x128x128xf32, #tpu.memory_space<vmem>>, vector<1x128x128xf32>
    %106 = vector.shape_cast %105 : vector<1x128x128xf32> to vector<128x128xf32>
    %c2_112 = arith.constant 2 : index
    %c0_113 = arith.constant 0 : index
    %c0_114 = arith.constant 0 : index
    %107 = vector.load %arg8[%c2_112, %c0_113, %c0_114] : memref<3x128x128xf32, #tpu.memory_space<vmem>>, vector<1x128x128xf32>
    %108 = vector.shape_cast %107 : vector<1x128x128xf32> to vector<128x128xf32>
    %c0_115 = arith.constant 0 : index
    %c0_116 = arith.constant 0 : index
    %109 = vector.load %arg9[%c0_115, %c0_116] : memref<1x128xf32, #tpu.memory_space<vmem>>, vector<1x128xf32>
    %cst_117 = arith.constant dense<0.000000e+00> : vector<16x128xf32>
    %110 = tpu.matmul %1, %102, %cst_117 {dimension_numbers = #tpu.dot_dimension_numbers<[1], [0], [0], [1], [0, 0, 1, 1], [], []>} : vector<16x16xf32>, vector<16x128xf32>, vector<16x128xf32> -> vector<16x128xf32>
    %cst_118 = arith.constant dense<0.000000e+00> : vector<16x128xf32>
    %111 = tpu.matmul %3, %102, %cst_118 {dimension_numbers = #tpu.dot_dimension_numbers<[1], [0], [0], [1], [0, 0, 1, 1], [], []>} : vector<16x16xf32>, vector<16x128xf32>, vector<16x128xf32> -> vector<16x128xf32>
    %cst_119 = arith.constant dense<0.000000e+00> : vector<16x128xf32>
    %112 = tpu.matmul %110, %104, %cst_119 {dimension_numbers = #tpu.dot_dimension_numbers<[1], [0], [0], [1], [0, 0, 1, 1], [], []>} : vector<16x128xf32>, vector<128x128xf32>, vector<16x128xf32> -> vector<16x128xf32>
    %cst_120 = arith.constant dense<0.000000e+00> : vector<16x128xf32>
    %113 = tpu.matmul %102, %106, %cst_120 {dimension_numbers = #tpu.dot_dimension_numbers<[1], [0], [0], [1], [0, 0, 1, 1], [], []>} : vector<16x128xf32>, vector<128x128xf32>, vector<16x128xf32> -> vector<16x128xf32>
    %114 = arith.addf %112, %113 : vector<16x128xf32>
    %cst_121 = arith.constant dense<0.000000e+00> : vector<16x128xf32>
    %115 = tpu.matmul %111, %108, %cst_121 {dimension_numbers = #tpu.dot_dimension_numbers<[1], [0], [0], [1], [0, 0, 1, 1], [], []>} : vector<16x128xf32>, vector<128x128xf32>, vector<16x128xf32> -> vector<16x128xf32>
    %116 = arith.addf %114, %115 : vector<16x128xf32>
    %117 = vector.broadcast %109 : vector<1x128xf32> to vector<16x128xf32>
    %118 = arith.addf %116, %117 : vector<16x128xf32>
    %119 = arith.addf %118, %24 : vector<16x128xf32>
    %120 = vector.shape_cast %119 : vector<16x128xf32> to vector<1x16x128xf32>
    %c0_122 = arith.constant 0 : index
    %c0_123 = arith.constant 0 : index
    %c0_124 = arith.constant 0 : index
    %121 = vector.load %arg10[%c0_122, %c0_123, %c0_124] : memref<1x16x128xf32, #tpu.memory_space<vmem>>, vector<1x16x128xf32>
    tpu.vector_store %arg10[%c0_122, %c0_123, %c0_124], %120 {strides = array<i32>} : memref<1x16x128xf32, #tpu.memory_space<vmem>>, vector<1x16x128xf32>,
    return
  }
  func.func @transform_0(%arg0: i32) -> (i32, i32, i32) {
    %c0_i32 = arith.constant 0 : i32
    %c0_i32_0 = arith.constant 0 : i32
    %c0_i32_1 = arith.constant 0 : i32
    return %arg0, %c0_i32, %c0_i32_0 : i32, i32, i32
  }
  func.func @transform_1(%arg0: i32) -> (i32, i32) {
    %c0_i32 = arith.constant 0 : i32
    %c0_i32_0 = arith.constant 0 : i32
    %c0_i32_1 = arith.constant 0 : i32
    return %c0_i32, %c0_i32_0 : i32, i32
  }
  func.func @transform_2(%arg0: i32) -> (i32, i32, i32) {
    %c0_i32 = arith.constant 0 : i32
    %c0_i32_0 = arith.constant 0 : i32
    %c0_i32_1 = arith.constant 0 : i32
    %c0_i32_2 = arith.constant 0 : i32
    return %c0_i32, %c0_i32_0, %c0_i32_1 : i32, i32, i32
  }
  func.func @transform_3(%arg0: i32) -> (i32, i32, i32) {
    %c0_i32 = arith.constant 0 : i32
    %c0_i32_0 = arith.constant 0 : i32
    %c0_i32_1 = arith.constant 0 : i32
    %c0_i32_2 = arith.constant 0 : i32
    return %c0_i32, %c0_i32_0, %c0_i32_1 : i32, i32, i32
  }
  func.func @transform_4(%arg0: i32) -> (i32, i32) {
    %c0_i32 = arith.constant 0 : i32
    %c0_i32_0 = arith.constant 0 : i32
    %c0_i32_1 = arith.constant 0 : i32
    return %c0_i32, %c0_i32_0 : i32, i32
  }
  func.func @transform_5(%arg0: i32) -> (i32, i32, i32, i32) {
    %c0_i32 = arith.constant 0 : i32
    %c0_i32_0 = arith.constant 0 : i32
    %c0_i32_1 = arith.constant 0 : i32
    %c0_i32_2 = arith.constant 0 : i32
    %c0_i32_3 = arith.constant 0 : i32
    return %c0_i32, %c0_i32_0, %c0_i32_1, %c0_i32_2 : i32, i32, i32, i32
  }
  func.func @transform_6(%arg0: i32) -> (i32, i32, i32) {
    %c0_i32 = arith.constant 0 : i32
    %c0_i32_0 = arith.constant 0 : i32
    %c0_i32_1 = arith.constant 0 : i32
    %c0_i32_2 = arith.constant 0 : i32
    return %c0_i32, %c0_i32_0, %c0_i32_1 : i32, i32, i32
  }
  func.func @transform_7(%arg0: i32) -> (i32, i32, i32) {
    %c0_i32 = arith.constant 0 : i32
    %c0_i32_0 = arith.constant 0 : i32
    %c0_i32_1 = arith.constant 0 : i32
    %c0_i32_2 = arith.constant 0 : i32
    return %c0_i32, %c0_i32_0, %c0_i32_1 : i32, i32, i32
  }
  func.func @transform_8(%arg0: i32) -> (i32, i32) {
    %c0_i32 = arith.constant 0 : i32
    %c0_i32_0 = arith.constant 0 : i32
    %c0_i32_1 = arith.constant 0 : i32
    return %c0_i32, %c0_i32_0 : i32, i32
  }
  func.func @transform_9(%arg0: i32) -> (i32, i32, i32) {
    %c0_i32 = arith.constant 0 : i32
    %c0_i32_0 = arith.constant 0 : i32
    %c0_i32_1 = arith.constant 0 : i32
    return %arg0, %c0_i32, %c0_i32_0 : i32, i32, i32
  }
}

</mosaic_0001>

<bundles_post_ra>
// kernel: tpu_custom_call.1
= control target key start
LH: loop header
LB: loop body
LE: loop exit
PB: predicated region body
PF: predicated region fallthrough
CT: control target
= control target key end

     0   :  { %s4984_s0 = inlined_call_operand.hbm [shape: f32[2,16,48], index: 0, kind: input, shape index: {}]   ;;  %s4985_s1 = inlined_call_operand.vmem [shape: f32[1,48], index: 1, kind: input, shape index: {}]   ;;  %s4986_s2 = inlined_call_operand.hbm [shape: f32[2,16,16], index: 2, kind: input, shape index: {}]   ;;  %s4987_s3 = inlined_call_operand.hbm [shape: f32[3,48,128], index: 3, kind: input, shape index: {}]   ;;  %s4988_s4 = inlined_call_operand.vmem [shape: f32[1,128], index: 4, kind: input, shape index: {}]   ;;  %s4989_s5 = inlined_call_operand.hbm [shape: f32[4,3,128,128], index: 5, kind: input, shape index: {}]   ;;  %s4990_s6 = inlined_call_operand.vmem [shape: f32[4,1,128], index: 6, kind: input, shape index: {}]   ;;  %s4991_s7 = inlined_call_operand.hbm [shape: f32[3,128,128], index: 7, kind: input, shape index: {}]   ;;  %s4992_s8 = inlined_call_operand.vmem [shape: f32[1,128], index: 8, kind: input, shape index: {}]   ;;  %s4993_s9 = inlined_call_operand.hbm [shape: f32[2,16,128], index: 9, kind: output, shape index: {}]  }
   0x1   :  { %5000 = sst [smem:[#allocation16_spill]] %s4986_s2 }
   0x2   :  { %5001 = sst [smem:[#allocation17_spill]] %s4987_s3 }
   0x3   :  { %5002 = sst [smem:[#allocation18_spill]] %s4989_s5 }
   0x4   :  { %14 = vsyncpa [#allocation3], 0 }
   0x5   :  { %16 = vsyncpa [#allocation3 + $0x1], 0 }
   0x6   :  { %17 = vsyncpa [#allocation6], 0 }
   0x7   :  { %18 = vsyncpa [#allocation9], 0 }
   0x8   :  { %19 = vsyncpa [#allocation4], 0 }
   0x9   :  { %21 = vsyncpa [#allocation4 + $0x1], 0  ;;  %s4611_s30 = smov 0   ;;  %s4613_s10 = smov 0  }
   0xa   :  { %s4615_s11 = smov 0   ;;  %s4617_s12 = smov 0  }
   0xb LB: > { %s4632_s13 = sadd.s32 4294967295, %s4549_s12   ;;  %s3190_s14 = sadd.s32 4294967294, %s4549_s12   ;;  %s4549_s12 = sphi %s4617_s12, %s5026_s12   ;;  %s4545_s11 = sphi %s4615_s11, %s5025_s11   ;;  %s4541_s10 = sphi %s4613_s10, %s5024_s10   ;;  %s4537_s30 = sphi %s4611_s30, %s5023_s30  }
   0xc   : > { %p47_p0 = scmp.ne.s32.totalorder %s4541_s10, %s4537_s30  ;;  %p4994_p1 = scmp.eq.s32.totalorder %s4632_s13, 0 }
   0xd   : > { %p239_p2 = scmp.eq.s32.totalorder %s4632_s13, 1  ;;  %p245_p3 = scmp.eq.s32.totalorder %s3190_s14, 1 }
   0xe   : > { %p4641_p4 = por %p4994_p1, %p47_p0  ;;  %p3191_p5 = scmp.ge.s32.totalorder %s4549_s12, 1 }
   0xf   : > { %p4646_p6 = por %p245_p3, %p47_p0  ;;  %p252_p7 = scmp.lt.s32.totalorder %s4549_s12, 3 }
  0x10   : > { %s5003_s15 = scalar_select %p4641_p4, 1, 0 }
  0x11   : > { %s5004_s16 = scalar_select %p4646_p6, 1, 0 }
  0x12   : > { %p4651_p8 = pnand %p3191_p5, %p252_p7  ;;  %s4551_s18 = smov [#allocation5]  }
  0x13   : > { %s267_s19 = sshll.u32 %s4551_s18, 4  ;;  %s4552_s21 = smov [#allocation8]   ;;  %s268_s19 = int_to_ptr.vmem [resolvable:$true] %s267_s19 }
  0x14   : > { %s5005_s17 = scalar_select %p4651_p8, 1, 0 }
  0x15   : > { %p4270_p9 = pneg %p4651_p8  ;;  %s296_s22 = sshll.u32 %s4552_s21, 4  ;;  %s297_s22 = int_to_ptr.vmem [resolvable:$true] %s296_s22 }
  0x16   : > { %s4553_s23 = smov [#allocation7]   ;;  %s4356_s25 = scalar_lea.vmem %s268_s19, 512 }
  0x17   : > { %p4660_p11 = pnand %p4270_p9, %p4994_p1  ;;  %s280_s24 = sshll.u32 %s4553_s23, 4  ;;  %s281_s24 = int_to_ptr.vmem [resolvable:$true] %s280_s24 }
  0x18   : > { %p4357_p13 = scmp.ne.s32.totalorder %s268_s19, %s4356_s25  ;;  %p4364_p5 = scmp.lt.s32.totalorder %s268_s19, %s268_s19 }
  0x19   : > { %p4347_p12 = pneg %p4660_p11  ;;  %p4365_p7 = scmp.lt.s32.totalorder %s4356_s25, %s4356_s25 }
  0x1b   : > { %p4359_p0 = pnand %p4357_p13, %p4347_p12  ;;  %p4366_p9 = por %p4365_p7, %p4364_p5 }
  0x1d   : > { %p4360_p3 = pneg %p4359_p0 }
  0x1f   : > { %p4367_p10 = pnand %p4366_p9, %p4360_p3 }
  0x21   : > { %4370 = shalt.err (!%p4367_p10)
}
  0x22   : > { %s4995_s26 = smov 128   ;;  %s4996_s27 = smov 8  }
  0x23   : > { %s5007_s2 = sld [smem:[#allocation16_spill]]  ;;  %s4382_s14 = scalar_lea.vmem %s297_s22, 24576 }
  0x24   : > { %p4383_p13 = scmp.ne.s32.totalorder %s297_s22, %s4382_s14  ;;  %p4390_p3 = scmp.lt.s32.totalorder %s297_s22, %s297_s22 }
  0x25   : > { %p4391_p10 = scmp.lt.s32.totalorder %s4382_s14, %s4382_s14 }
  0x26   : > { %p4385_p0 = pnand %p4383_p13, %p4347_p12 }
  0x27   : > { %p4392_p7 = por %p4391_p10, %p4390_p3 }
  0x28   : > { %p4386_p5 = pneg %p4385_p0 }
  0x29   : > { %4273 = dma.hbm_to_vmem [thread:$0]  (!%p4660_p11), %s5007_s2, 512, %s268_s19, [#allocation6], %s4995_s26, %s4995_s26, %s4996_s27  }
  0x2a   : > { %p4393_p9 = pnand %p4392_p7, %p4386_p5 }
  0x2c   : > { %4396 = shalt.err (!%p4393_p9)
}
  0x2d   : > { %s5008_s5 = sld [smem:[#allocation18_spill]]  ;;  %s4408_s19 = scalar_lea.vmem %s281_s24, 2304 }
  0x2e   : > { %p4409_p1 = scmp.ne.s32.totalorder %s281_s24, %s4408_s19  ;;  %p4416_p3 = scmp.lt.s32.totalorder %s281_s24, %s281_s24 }
  0x2f   : > { %p4417_p5 = scmp.lt.s32.totalorder %s4408_s19, %s4408_s19 }
  0x30   : > { %p4411_p13 = pnand %p4409_p1, %p4347_p12 }
  0x31   : > { %p4418_p10 = por %p4417_p5, %p4416_p3 }
  0x32   : > { %p4412_p0 = pneg %p4411_p13 }
  0x33   : > { %4279 = dma.hbm_to_vmem [thread:$0]  (!%p4660_p11), %s5008_s5, 24576, %s297_s22, [#allocation9], %s4995_s26, %s4995_s26, %s4996_s27  }
  0x34   : > { %p4419_p7 = pnand %p4418_p10, %p4412_p0 }
  0x36   : > { %4422 = shalt.err (!%p4419_p7)
}
  0x37   : > { %s5009_s3 = sld [smem:[#allocation17_spill]]  ;;  %s4556_s22 = smov [#allocation10]  }
  0x38   : > { %s312_s28 = sshll.u32 %s4556_s22, 4  ;;  %s313_s28 = int_to_ptr.vmem [resolvable:$true] %s312_s28 }
  0x39   : > { %s4434_s29 = scalar_lea.vmem %s313_s28, 6144  ;;  %p4442_p0 = scmp.lt.s32.totalorder %s313_s28, %s313_s28 }
  0x3a   : > { %p4435_p1 = scmp.ne.s32.totalorder %s313_s28, %s4434_s29  ;;  %p4443_p3 = scmp.lt.s32.totalorder %s4434_s29, %s4434_s29 }
  0x3c   : > { %p4437_p9 = pnand %p4435_p1, %p4347_p12  ;;  %p4444_p5 = por %p4443_p3, %p4442_p0 }
  0x3d   : > { %4276 = dma.hbm_to_vmem [thread:$0]  (!%p4660_p11), %s5009_s3, 2304, %s281_s24, [#allocation6], %s4995_s26, %s4995_s26, %s4996_s27  }
  0x3e   : > { %p4438_p13 = pneg %p4437_p9 }
  0x40   : > { %p4445_p10 = pnand %p4444_p5, %p4438_p13 }
  0x42   : > { %4448 = shalt.err (!%p4445_p10)
}
  0x43   : > { %4282 = dma.hbm_to_vmem [thread:$0]  (!%p4660_p11), %s4991_s7, 6144, %s313_s28, [#allocation9], %s4995_s26, %s4995_s26, %s4996_s27  }
  0x44   : > { %s4711_s18 = sadd.s32 1, %s4549_s12   ;;  %s34_s20 = sadd.s32 1, %s4545_s11 }
  0x45   : > { %s31_s21 = ssub.s32 %s4549_s12, %s4711_s18  ;;  %p41_p12 = scmp.ne.s32.totalorder %s4545_s11, %s4541_s10 }
  0x46   : > { %p32_p7 = scmp.eq.s32.totalorder %s31_s21, 0  ;;  %p42_p1 = scmp.eq.s32.totalorder %s4549_s12, 0 }
  0x47   : > { %p4721_p9 = por %p239_p2, %p41_p12  ;;  %p4295_p13 = scmp.lt.s32.totalorder %s4549_s12, 2 }
  0x48   : > { %s4727_s23 = scalar_select %p32_p7, %s4545_s11, %s34_s20  }
  0x49   : > { %s5010_s19 = scalar_select %p4721_p9, 1, 0 }
  0x4a   : > { %p43_p0 = por %p42_p1, %p41_p12  ;;  %s329_s25 = sand.u32 1, %s4545_s11  }
  0x4b   : > { %s3197_s22 = sshll.u32 %s329_s25, 4  ;;  %s3252_s28 = sshll.u32 %s4549_s12, 8 }
  0x4c   : > { %s4734_s14 = scalar_lea.hbm %s4984_s0, %s3252_s28  ;;  %s333_s21 = scalar_lea.vmem [#allocation2], %s3197_s22 }
  0x4d   : > { %s340_s26 = sshll.u32 %s333_s21, 4  ;;  %p4738_p2 = pnand %p4295_p13, %p43_p0  ;;  %s4736_s26 = int_to_ptr.vmem [resolvable:$true] %s340_s26 }
  0x4e   : > { %s4742_s20 = scalar_lea.sflag [#allocation3], %s329_s25  ;;  %s4449_s2 = scalar_lea.hbm %s4734_s14, 256 }
  0x4f   : > { %p4450_p11 = scmp.ne.s32.totalorder %s4734_s14, %s4449_s2  ;;  %p4451_p3 = pneg %p4738_p2 }
  0x50   : > { %s4454_s22 = scalar_lea.hbm %s4984_s0, 512  ;;  %p4455_p12 = scmp.lt.s32.totalorder %s4734_s14, %s4984_s0 }
  0x51   : > { %p4452_p5 = pnand %p4451_p3, %p4450_p11  ;;  %p4456_p7 = scmp.lt.s32.totalorder %s4454_s22, %s4449_s2 }
  0x53   : > { %p4453_p10 = pneg %p4452_p5  ;;  %p4457_p1 = por %p4456_p7, %p4455_p12 }
  0x55   : > { %p4458_p13 = pnand %p4457_p1, %p4453_p10 }
  0x57   : > { %4461 = shalt.err (!%p4458_p13)
}
  0x58   : > { %s4462_s25 = scalar_lea.vmem %s4736_s26, 256  ;;  %s4557_s3 = smov [#allocation2]  }
  0x59   : > { %p4463_p0 = scmp.ne.s32.totalorder %s4736_s26, %s4462_s25  ;;  %s4467_s5 = sshll.u32 %s4557_s3, 4  ;;  %s4468_s5 = int_to_ptr.vmem [resolvable:$false] %s4467_s5 }
  0x5a   : > { %s4469_s28 = scalar_lea.vmem %s4468_s5, 512  ;;  %p4470_p5 = scmp.lt.s32.totalorder %s4736_s26, %s4468_s5 }
  0x5b   : > { %p4465_p6 = pnand %p4463_p0, %p4451_p3  ;;  %p4471_p9 = scmp.lt.s32.totalorder %s4469_s28, %s4462_s25 }
  0x5d   : > { %p4466_p11 = pneg %p4465_p6  ;;  %p4472_p4 = por %p4471_p9, %p4470_p5 }
  0x5f   : > { %p4473_p8 = pnand %p4472_p4, %p4466_p11 }
  0x61   : > { %4476 = shalt.err (!%p4473_p8)
}
  0x62   : > { %s5012_s2 = smov 8   ;;  %s5013_s29 = smov 128  }
  0x63   : > { %4286 = dma.hbm_to_vmem [thread:$0]  (!%p4738_p2), %s4734_s14, 256, %s4736_s26, %s4742_s20, %s5013_s29, %s5013_s29, %s5012_s2  }
  0x64   : > { %p5014_p6 = scmp.ne.s32.totalorder %s5005_s17, 0 }
  0x65   : > { %s4769_s3 = sand.u32 (!%p5014_p6), 1, %s4541_s10   ;;  %p5015_p4 = scmp.ne.s32.totalorder (!%p5014_p6), %s5003_s15, 0 }
  0x66   : > { %352 = sbr.rel (%p5014_p6) target bundleno = 2561 (0xa01), region = 56  ;;  %s3201_s5 = sshll.u32 (!%p5014_p6), %s4769_s3, 4 }
  0x67   : > { %s355_s22 = scalar_lea.sflag (!%p5014_p6), [#allocation3], %s4769_s3  ;;  %s358_s27 = scalar_lea.vmem (!%p5014_p6), [#allocation2], %s3201_s5 }
  0x6b   : > { %4520 = dma.done.wait (%p5015_p4), %s355_s22, 256  }
  0x6c   : > { %4522 = vsyncadd (%p5015_p4), %s355_s22, 4294967040  ;;  %p5016_p8 = scmp.eq.s32.totalorder %s4632_s13, 0 }
  0x6e   : > { %4524 = dma.done.wait (%p5016_p8), [#allocation6], 2816   ;;  %p5017_p9 = pmov %p5016_p8 }
  0x6f   : > { %p5018_p2 = pmov %p5016_p8 }
  0x70   : > { %4526 = vsyncadd (%p5017_p9), [#allocation6], 4294964480 }
  0x71   : > { %4528 = dma.done.wait (%p5018_p2), [#allocation9], 30720   ;;  %p5019_p3 = pmov %p5018_p2 }
  0x72   : > { %vm446_vm0 = vcmask 130048   ;;  %v415_v0 = vld [vmem:[%s358_s27 + $0x8] sm:$0xff]  ;;  %v3207_v1 = vld [vmem:[%s4985_s1] ss:$0 sm:$0xff]  ;;  %v4792_v6 = vld [vmem:[#allocation5 + $0x10] sm:$0xff]  ;;  %vm609_vm1 = vcmask 392192  }
  0x73   : > { %4530 = vsyncadd (%p5019_p3), [#allocation9], 4294936576  ;;  %v414_v2 = vld [vmem:[%s358_s27] sm:$0xff]  ;;  %v424_v3 = vadd.f32 %v3207_v1, %v415_v0  ;;  %3607 = vmatprep.mubr.msk.f32.mxu1 %vm446_vm0, %v4792_v6  ;;  %v4798_v7 = vld [vmem:[#allocation5 + $0x8] sm:$0xff]  ;;  %s408_s26 = scalar_lea.vmem [#allocation11], %s3201_s5  ;;  %s3253_s14 = sshll.u32 %s4632_s13, 8 }
  0x74   : > { %v423_v4 = vadd.f32 %v3207_v1, %v414_v2  ;;  %v4790_v5 = vld [vmem:[#allocation5] sm:$0xff]  ;;  %v4800_v8 = vld [vmem:[#allocation5 + $0x18] sm:$0xff]  ;;  %v436_v10 = vld [vmem:[#allocation7 + $0x50] sm:$0xff]  ;;  %s3079_s15 = sshll.u32 %s408_s26, 4  ;;  %s4940_s21 = scalar_lea.hbm %s4993_s9, %s3253_s14  ;;  %s4935_s15 = int_to_ptr.vmem [resolvable:$true] %s3079_s15 }
  0x75   : > { %3600 = vmatprep.mubr.msk.f32.mxu0 %vm446_vm0, %v4790_v5  ;;  %3596 = vmatprep.subr.mxu0 %v424_v3  ;;  %v437_v9 = vld [vmem:[#allocation7 + $0x58] sm:$0xff]  ;;  %v435_v11 = vld [vmem:[#allocation7 + $0x48] sm:$0xff]  ;;  %v434_v12 = vld [vmem:[#allocation7 + $0x40] sm:$0xff]  ;;  %s3066_s5 = scalar_lea.sflag [#allocation4], %s4769_s3  ;;  %s4477_s25 = scalar_lea.vmem %s4935_s15, 256 }
  0x76   : > { %3603 = vmatprep.subr.mxu1 %v424_v3  ;;  %3597 = vmatpush3.msra.mxu0 %v424_v3  ;;  %v433_v13 = vld [vmem:[#allocation7 + $0x38] sm:$0xff]  ;;  %v432_v14 = vld [vmem:[#allocation7 + $0x30] sm:$0xff]  ;;  %v430_v15 = vld [vmem:[#allocation7 + $0x28] sm:$0xff]  ;;  %p4478_p10 = scmp.ne.s32.totalorder %s4935_s15, %s4477_s25  ;;  %p5020_p12 = scmp.ne.s32.totalorder %s5010_s19, 0 }
  0x77   : > { %3604 = vmatpush3.msra.mxu1 %v424_v3  ;;  %3598 = vmatprep.subr.mxu0 %v423_v4  ;;  %v429_v16 = vld [vmem:[#allocation7 + $0x20] sm:$0xff]  ;;  %v428_v17 = vld [vmem:[#allocation7 + $0x18] sm:$0xff]  ;;  %v427_v18 = vld [vmem:[#allocation7 + $0x10] sm:$0xff]  ;;  %s4558_s13 = smov [#allocation11]  }
  0x78   : > { %3605 = vmatprep.subr.mxu1 %v423_v4  ;;  %3599 = vmatpush3.msra.mxu0 %v423_v4  ;;  %v426_v19 = vld [vmem:[#allocation7 + $0x8] sm:$0xff]  ;;  %v425_v20 = vld [vmem:[#allocation7] sm:$0xff]  ;;  %v442_v27 = vld [vmem:[#allocation7 + $0x78] sm:$0xff]  ;;  %p4479_p7 = pnand %p4478_p10, %p5020_p12  ;;  %s4481_s28 = sshll.u32 %s4558_s13, 4  ;;  %s4482_s28 = int_to_ptr.vmem [resolvable:$false] %s4481_s28 }
  0x79   : > { %3606 = vmatpush3.msra.mxu1 %v423_v4  ;;  %3601 = vmatmul.mubr.msk.f32.vlgmr.msra.gmra.mxu0 %vm446_vm0, %v4798_v7  ;;  %v444_v21 = vld [vmem:[#allocation7 + $0x88] sm:$0xff]  ;;  %v443_v26 = vld [vmem:[#allocation7 + $0x80] sm:$0xff]  ;;  %v441_v28 = vld [vmem:[#allocation7 + $0x70] sm:$0xff]  ;;  %s4483_s2 = scalar_lea.vmem %s4482_s28, 512  ;;  %p4484_p13 = scmp.lt.s32.totalorder %s4935_s15, %s4482_s28 }
  0x7a   : > { %3608 = vmatmul.mubr.msk.f32.vlgmr.msra.gmra.mxu1 %vm446_vm0, %v4800_v8  ;;  %3610 = vmatprep.subr.mxu0 %v437_v9  ;;  %v440_v29 = vld [vmem:[#allocation7 + $0x68] sm:$0xff]  ;;  %v439_v30 = vld [vmem:[#allocation7 + $0x60] sm:$0xff]  ;;  %v876_v33 = vld [vmem:[#allocation8 + $0x68] sm:$0xff]  ;;  %p4480_p1 = pneg %p4479_p7  ;;  %p4485_p0 = scmp.lt.s32.totalorder %s4483_s2, %s4477_s25 }
  0x7b   : > { %3622 = vmatprep.mubr.msk.f32.mxu0 %vm609_vm1, %v423_v4  ;;  %3611 = vmatpush3.msra.mxu0 %v437_v9  ;;  %v878_v31 = vld [vmem:[#allocation8 + $0x78] sm:$0xff]  ;;  %v877_v32 = vld [vmem:[#allocation8 + $0x70] sm:$0xff]  ;;  %v875_v34 = vld [vmem:[#allocation8 + $0x60] sm:$0xff] }
  0x7c   : > { %3659 = vmatprep.mubr.msk.f32.mxu1 %vm446_vm0, %v4790_v5  ;;  %3612 = vmatprep.subr.mxu0 %v436_v10  ;;  %v874_v35 = vld [vmem:[#allocation8 + $0x58] sm:$0xff]  ;;  %v873_v36 = vld [vmem:[#allocation8 + $0x50] sm:$0xff]  ;;  %v872_v37 = vld [vmem:[#allocation8 + $0x48] sm:$0xff]  ;;  %p4486_p11 = por %p4485_p0, %p4484_p13 }
  0x7d   : > { %3613 = vmatpush3.msra.mxu0 %v436_v10  ;;  %v871_v38 = vld [vmem:[#allocation8 + $0x40] sm:$0xff]  ;;  %v870_v39 = vld [vmem:[#allocation8 + $0x38] sm:$0xff]  ;;  %v869_v40 = vld [vmem:[#allocation8 + $0x30] sm:$0xff] }
  0x7e   : > { %3614 = vmatprep.subr.mxu0 %v435_v11  ;;  %v868_v41 = vld [vmem:[#allocation8 + $0x28] sm:$0xff]  ;;  %v867_v42 = vld [vmem:[#allocation8 + $0x20] sm:$0xff]  ;;  %v866_v43 = vld [vmem:[#allocation8 + $0x18] sm:$0xff]  ;;  %p4487_p5 = pnand %p4486_p11, %p4480_p1 }
  0x7f   : > { %3615 = vmatpush3.msra.mxu0 %v435_v11  ;;  %v865_v44 = vld [vmem:[#allocation8 + $0x10] sm:$0xff]  ;;  %v895_v58 = vld [vmem:[#allocation8 + $0xf8] sm:$0xff]  ;;  %v893_v60 = vld [vmem:[#allocation8 + $0xe8] sm:$0xff] }
  0x80   : > { %3616 = vmatprep.subr.mxu0 %v434_v12  ;;  %v3218_v50 = vld [vmem:[%s4988_s4] ss:$0 sm:$0xff]  ;;  %v892_v61 = vld [vmem:[#allocation8 + $0xe0] sm:$0xff]  ;;  %v891_v62 = vld [vmem:[#allocation8 + $0xd8] sm:$0xff] }
  0x81   : > { %3617 = vmatpush3.msra.mxu0 %v434_v12  ;;  %v894_v59 = vld [vmem:[#allocation8 + $0xf0] sm:$0xff]  ;;  %v889_v0 = vld [vmem:[#allocation8 + $0xc8] sm:$0xff]  ;;  %v888_v1 = vld [vmem:[#allocation8 + $0xc0] sm:$0xff] }
  0x82   : > { %3618 = vmatprep.subr.mxu0 %v433_v13  ;;  %v890_v63 = vld [vmem:[#allocation8 + $0xd0] sm:$0xff]  ;;  %v887_v2 = vld [vmem:[#allocation8 + $0xb8] sm:$0xff]  ;;  %v885_v4 = vld [vmem:[#allocation8 + $0xa8] sm:$0xff] }
  0x83   : > { %3619 = vmatpush3.msra.mxu0 %v433_v13  ;;  %v884_v9 = vld [vmem:[#allocation8 + $0xa0] sm:$0xff]  ;;  %v883_v10 = vld [vmem:[#allocation8 + $0x98] sm:$0xff]  ;;  %v882_v11 = vld [vmem:[#allocation8 + $0x90] sm:$0xff] }
  0x84   : > { %3620 = vmatprep.subr.mxu0 %v432_v14  ;;  %v881_v12 = vld [vmem:[#allocation8 + $0x88] sm:$0xff]  ;;  %v880_v13 = vld [vmem:[#allocation8 + $0x80] sm:$0xff] }
  0x85   : > { %3621 = vmatpush3.msra.mxu0 %v432_v14  ;;  %v912_v14 = vld [vmem:[#allocation8 + $0x178] sm:$0xff] }
  0x86   : > { %3623 = vmatmul.mubr.msk.f32.vlgmr.msra.gmra.mxu0 %vm609_vm1, %v424_v3  ;;  %3625 = vmatprep.subr.mxu0 %v430_v15  ;;  %v886_v3 = vld [vmem:[#allocation8 + $0xb0] sm:$0xff] }
  0x87   : > { %3626 = vmatpush3.msra.mxu0 %v430_v15  ;;  %v911_v15 = vld [vmem:[#allocation8 + $0x170] sm:$0xff] }
  0x88   : > { %3627 = vmatprep.subr.mxu0 %v429_v16 }
  0x89   : > { %3628 = vmatpush3.msra.mxu0 %v429_v16  ;;  %v910_v16 = vld [vmem:[#allocation8 + $0x168] sm:$0xff] }
  0x8a   : > { %3629 = vmatprep.subr.mxu0 %v428_v17 }
  0x8b   : > { %3630 = vmatpush3.msra.mxu0 %v428_v17  ;;  %v909_v17 = vld [vmem:[#allocation8 + $0x160] sm:$0xff] }
  0x8c   : > { %3631 = vmatprep.subr.mxu0 %v427_v18 }
  0x8d   : > { %3632 = vmatpush3.msra.mxu0 %v427_v18  ;;  %v908_v18 = vld [vmem:[#allocation8 + $0x158] sm:$0xff] }
  0x8e   : > { %3633 = vmatprep.subr.mxu0 %v426_v19 }
  0x8f   : > { %3634 = vmatpush3.msra.mxu0 %v426_v19  ;;  %v907_v19 = vld [vmem:[#allocation8 + $0x150] sm:$0xff] }
  0x90   : > { %3635 = vmatprep.subr.mxu0 %v425_v20 }
  0x91   : > { %3636 = vmatpush3.msra.mxu0 %v425_v20  ;;  %v906_v20 = vld [vmem:[#allocation8 + $0x148] sm:$0xff] }
  0x92   : > { %3640 = vmatprep.subr.mxu0 %v444_v21 }
 0x139   : > { %v3602_v22 = vpop.f32.mrf.mxu0 }
 0x13a   : > { %v3609_v23 = vpop.f32.mrf.mxu1 }
 0x13b   : > { %v519_v24 = vpop.f32.mrf.mxu0 }
 0x13c   : > { %v600_v25 = vpop.f32.mrf.mxu1  ;;  %3637 = vmatprep.mubr.msk.f32.mxu0 %vm609_vm1, %v519_v24  ;;  %v902_v24 = vld [vmem:[#allocation8 + $0x128] sm:$0xff] }
 0x13d   : > { %3638 = vmatmul.mubr.msk.f32.vlgmr.msra.gmra.mxu0 %vm609_vm1, %v3602_v22  ;;  %v904_v22 = vld [vmem:[#allocation8 + $0x138] sm:$0xff] }
 0x13e   : > { %3641 = vmatpush3.msra.mxu0 %v444_v21  ;;  %3652 = vmatprep.mubr.msk.f32.mxu0 %vm609_vm1, %v600_v25  ;;  %v905_v21 = vld [vmem:[#allocation8 + $0x140] sm:$0xff] }
 0x13f   : > { %3642 = vmatprep.subr.mxu0 %v443_v26  ;;  %v901_v25 = vld [vmem:[#allocation8 + $0x120] sm:$0xff] }
 0x140   : > { %3643 = vmatpush3.msra.mxu0 %v443_v26  ;;  %v864_v26 = vld [vmem:[#allocation8 + $0x8] sm:$0xff] }
 0x141   : > { %3644 = vmatprep.subr.mxu0 %v442_v27 }
 0x142   : > { %3645 = vmatpush3.msra.mxu0 %v442_v27  ;;  %v900_v27 = vld [vmem:[#allocation8 + $0x118] sm:$0xff] }
 0x143   : > { %3646 = vmatprep.subr.mxu0 %v441_v28 }
 0x144   : > { %3647 = vmatpush3.msra.mxu0 %v441_v28  ;;  %v863_v28 = vld [vmem:[#allocation8] sm:$0xff] }
 0x145   : > { %3648 = vmatprep.subr.mxu0 %v440_v29 }
 0x146   : > { %3649 = vmatpush3.msra.mxu0 %v440_v29  ;;  %v3624_v45 = vpop.f32.mrf.mxu0  ;;  %v899_v29 = vld [vmem:[#allocation8 + $0x110] sm:$0xff] }
 0x147   : > { %3650 = vmatprep.subr.mxu0 %v439_v30 }
 0x148   : > { %3651 = vmatpush3.msra.mxu0 %v439_v30  ;;  %v682_v46 = vpop.f32.mrf.mxu0  ;;  %v898_v30 = vld [vmem:[#allocation8 + $0x108] sm:$0xff] }
 0x149   : > { %3653 = vmatmul.mubr.msk.f32.vlgmr.msra.gmra.mxu0 %vm609_vm1, %v3609_v23  ;;  %3704 = vmatprep.subr.mxu0 %v878_v31  ;;  %v903_v23 = vld [vmem:[#allocation8 + $0x130] sm:$0xff] }
 0x14a   : > { %3705 = vmatpush3.msra.mxu0 %v878_v31  ;;  %v897_v31 = vld [vmem:[#allocation8 + $0x100] sm:$0xff] }
 0x14b   : > { %3706 = vmatprep.subr.mxu0 %v877_v32 }
 0x14c   : > { %3707 = vmatpush3.msra.mxu0 %v877_v32 }
 0x14d   : > { %3708 = vmatprep.subr.mxu0 %v876_v33 }
 0x14e   : > { %3709 = vmatpush3.msra.mxu0 %v876_v33 }
 0x14f   : > { %3710 = vmatprep.subr.mxu0 %v875_v34 }
 0x150   : > { %3711 = vmatpush3.msra.mxu0 %v875_v34 }
 0x151   : > { %3712 = vmatprep.subr.mxu0 %v874_v35 }
 0x152   : > { %3713 = vmatpush3.msra.mxu0 %v874_v35 }
 0x153   : > { %3714 = vmatprep.subr.mxu0 %v873_v36 }
 0x154   : > { %3715 = vmatpush3.msra.mxu0 %v873_v36  ;;  %v1317_v36 = vld [vmem:[#allocation8 + $0x1f8] sm:$0xff] }
 0x155   : > { %3716 = vmatprep.subr.mxu0 %v872_v37 }
 0x156   : > { %3717 = vmatpush3.msra.mxu0 %v872_v37  ;;  %v1316_v37 = vld [vmem:[#allocation8 + $0x1f0] sm:$0xff] }
 0x157   : > { %3718 = vmatprep.subr.mxu0 %v871_v38 }
 0x158   : > { %3719 = vmatpush3.msra.mxu0 %v871_v38  ;;  %v1315_v38 = vld [vmem:[#allocation8 + $0x1e8] sm:$0xff] }
 0x159   : > { %3720 = vmatprep.subr.mxu0 %v870_v39 }
 0x15a   : > { %3721 = vmatpush3.msra.mxu0 %v870_v39  ;;  %v1314_v39 = vld [vmem:[#allocation8 + $0x1e0] sm:$0xff] }
 0x15b   : > { %3722 = vmatprep.subr.mxu0 %v869_v40 }
 0x15c   : > { %3723 = vmatpush3.msra.mxu0 %v869_v40  ;;  %v1313_v40 = vld [vmem:[#allocation8 + $0x1d8] sm:$0xff] }
 0x15d   : > { %3724 = vmatprep.subr.mxu0 %v868_v41 }
 0x15e   : > { %3725 = vmatpush3.msra.mxu0 %v868_v41  ;;  %v1312_v41 = vld [vmem:[#allocation8 + $0x1d0] sm:$0xff] }
 0x15f   : > { %3726 = vmatprep.subr.mxu0 %v867_v42 }
 0x160   : > { %3727 = vmatpush3.msra.mxu0 %v867_v42  ;;  %v1311_v42 = vld [vmem:[#allocation8 + $0x1c8] sm:$0xff] }
 0x161   : > { %3728 = vmatprep.subr.mxu0 %v866_v43 }
 0x162   : > { %3729 = vmatpush3.msra.mxu0 %v866_v43  ;;  %v1310_v43 = vld [vmem:[#allocation8 + $0x1c0] sm:$0xff] }
 0x163   : > { %3730 = vmatprep.subr.mxu0 %v865_v44 }
 0x164   : > { %3731 = vmatpush3.msra.mxu0 %v865_v44  ;;  %v1309_v44 = vld [vmem:[#allocation8 + $0x1b8] sm:$0xff] }
 0x165   : > { %3732 = vmatprep.subr.mxu0 %v864_v26 }
 0x166   : > { %3733 = vmatpush3.msra.mxu0 %v864_v26  ;;  %v1348_v26 = vld [vmem:[#allocation8 + $0x2e0] sm:$0xff] }
 0x167   : > { %3734 = vmatprep.subr.mxu0 %v863_v28 }
 0x168   : > { %3735 = vmatpush3.msra.mxu0 %v863_v28  ;;  %v1346_v28 = vld [vmem:[#allocation8 + $0x2d0] sm:$0xff] }
 0x1fd   : > { %v3639_v47 = vpop.f32.mrf.mxu0 }
 0x1fe   : > { %v769_v49 = vadd.f32 %v3639_v47, %v3624_v45  ;;  %v1308_v45 = vld [vmem:[#allocation8 + $0x1b0] sm:$0xff]  ;;  %v1306_v47 = vld [vmem:[#allocation8 + $0x1a0] sm:$0xff] }
 0x1ff   : > { %v763_v48 = vpop.f32.mrf.mxu0 }
 0x200   : > { %v764_v52 = vadd.f32 %v763_v48, %v682_v46  ;;  %v1307_v46 = vld [vmem:[#allocation8 + $0x1a8] sm:$0xff]  ;;  %v1305_v48 = vld [vmem:[#allocation8 + $0x198] sm:$0xff] }
 0x209   : > { %v3654_v51 = vpop.f32.mrf.mxu0 }
 0x20a   : > { %v854_v53 = vadd.f32 %v3654_v51, %v769_v49  ;;  %v1304_v49 = vld [vmem:[#allocation8 + $0x190] sm:$0xff] }
 0x20b   : > { %v844_v54 = vpop.f32.mrf.mxu0 }
 0x20c   : > { %v4817_v55 = vadd.f32 %v3218_v50, %v854_v53  ;;  %v853_v56 = vadd.f32 %v844_v54, %v764_v52 }
 0x20e   : > { %v4819_v57 = vadd.f32 %v3218_v50, %v853_v56  ;;  %3655 = vmatprep.subr.mxu1 %v4817_v55  ;;  %v3223_v56 = vld [vmem:[%s4990_s6] ss:$0 sm:$0xff] }
 0x20f   : > { %3656 = vmatpush3.msra.mxu1 %v4817_v55 }
 0x210   : > { %3657 = vmatprep.subr.mxu1 %v4819_v57 }
 0x211   : > { %3658 = vmatpush3.msra.mxu1 %v4819_v57 }
 0x212   : > { %3660 = vmatmul.mubr.msk.f32.vlgmr.msra.gmra.mxu1 %vm446_vm0, %v4798_v7  ;;  %3662 = vmatprep.subr.mxu1 %v4817_v55 }
 0x213   : > { %3663 = vmatpush3.msra.mxu1 %v4817_v55  ;;  %3666 = vmatprep.mubr.msk.f32.mxu1 %vm446_vm0, %v4792_v6 }
 0x214   : > { %3664 = vmatprep.subr.mxu1 %v4819_v57 }
 0x215   : > { %3665 = vmatpush3.msra.mxu1 %v4819_v57 }
 0x216   : > { %3667 = vmatmul.mubr.msk.f32.vlgmr.msra.gmra.mxu1 %vm446_vm0, %v4800_v8  ;;  %3669 = vmatprep.subr.mxu1 %v895_v58 }
 0x217   : > { %3670 = vmatpush3.msra.mxu1 %v895_v58  ;;  %3701 = vmatprep.mubr.f32.mxu1 %v4819_v57 }
 0x218   : > { %3671 = vmatprep.subr.mxu1 %v894_v59 }
 0x219   : > { %3672 = vmatpush3.msra.mxu1 %v894_v59 }
 0x21a   : > { %3673 = vmatprep.subr.mxu1 %v893_v60 }
 0x21b   : > { %3674 = vmatpush3.msra.mxu1 %v893_v60 }
 0x21c   : > { %3675 = vmatprep.subr.mxu1 %v892_v61 }
 0x21d   : > { %3676 = vmatpush3.msra.mxu1 %v892_v61 }
 0x21e   : > { %3677 = vmatprep.subr.mxu1 %v891_v62 }
 0x21f   : > { %3678 = vmatpush3.msra.mxu1 %v891_v62 }
 0x220   : > { %3679 = vmatprep.subr.mxu1 %v890_v63 }
 0x221   : > { %3680 = vmatpush3.msra.mxu1 %v890_v63 }
 0x222   : > { %3681 = vmatprep.subr.mxu1 %v889_v0 }
 0x223   : > { %3682 = vmatpush3.msra.mxu1 %v889_v0 }
 0x224   : > { %3683 = vmatprep.subr.mxu1 %v888_v1 }
 0x225   : > { %3684 = vmatpush3.msra.mxu1 %v888_v1 }
 0x226   : > { %3685 = vmatprep.subr.mxu1 %v887_v2 }
 0x227   : > { %3686 = vmatpush3.msra.mxu1 %v887_v2 }
 0x228   : > { %3687 = vmatprep.subr.mxu1 %v886_v3 }
 0x229   : > { %3688 = vmatpush3.msra.mxu1 %v886_v3  ;;  %v1334_v3 = vld [vmem:[#allocation8 + $0x278] sm:$0xff] }
 0x22a   : > { %3689 = vmatprep.subr.mxu1 %v885_v4 }
 0x22b   : > { %3690 = vmatpush3.msra.mxu1 %v885_v4  ;;  %v1333_v4 = vld [vmem:[#allocation8 + $0x270] sm:$0xff] }
 0x22c   : > { %3691 = vmatprep.subr.mxu1 %v884_v9 }
 0x22d   : > { %3692 = vmatpush3.msra.mxu1 %v884_v9  ;;  %v1332_v9 = vld [vmem:[#allocation8 + $0x268] sm:$0xff] }
 0x22e   : > { %3693 = vmatprep.subr.mxu1 %v883_v10 }
 0x22f   : > { %3694 = vmatpush3.msra.mxu1 %v883_v10  ;;  %v1331_v10 = vld [vmem:[#allocation8 + $0x260] sm:$0xff] }
 0x230   : > { %3695 = vmatprep.subr.mxu1 %v882_v11 }
 0x231   : > { %3696 = vmatpush3.msra.mxu1 %v882_v11  ;;  %v1330_v11 = vld [vmem:[#allocation8 + $0x258] sm:$0xff] }
 0x232   : > { %3697 = vmatprep.subr.mxu1 %v881_v12 }
 0x233   : > { %3698 = vmatpush3.msra.mxu1 %v881_v12  ;;  %v1329_v12 = vld [vmem:[#allocation8 + $0x250] sm:$0xff] }
 0x234   : > { %3699 = vmatprep.subr.mxu1 %v880_v13 }
 0x235   : > { %3700 = vmatpush3.msra.mxu1 %v880_v13  ;;  %v1328_v13 = vld [vmem:[#allocation8 + $0x248] sm:$0xff] }
 0x236   : > { %3702 = vmatmul.mubr.f32.vlgmr.msra.gmra.mxu1 %v4817_v55  ;;  %3739 = vmatprep.subr.mxu1 %v912_v14 }
 0x237   : > { %3740 = vmatpush3.msra.mxu1 %v912_v14  ;;  %v1327_v14 = vld [vmem:[#allocation8 + $0x240] sm:$0xff] }
 0x238   : > { %3741 = vmatprep.subr.mxu1 %v911_v15 }
 0x239   : > { %3742 = vmatpush3.msra.mxu1 %v911_v15  ;;  %v1326_v15 = vld [vmem:[#allocation8 + $0x238] sm:$0xff] }
 0x23a   : > { %3743 = vmatprep.subr.mxu1 %v910_v16 }
 0x23b   : > { %3744 = vmatpush3.msra.mxu1 %v910_v16  ;;  %v1325_v16 = vld [vmem:[#allocation8 + $0x230] sm:$0xff] }
 0x23c   : > { %3745 = vmatprep.subr.mxu1 %v909_v17 }
 0x23d   : > { %3746 = vmatpush3.msra.mxu1 %v909_v17  ;;  %v1324_v17 = vld [vmem:[#allocation8 + $0x228] sm:$0xff] }
 0x23e   : > { %3747 = vmatprep.subr.mxu1 %v908_v18 }
 0x23f   : > { %3748 = vmatpush3.msra.mxu1 %v908_v18  ;;  %v1323_v18 = vld [vmem:[#allocation8 + $0x220] sm:$0xff] }
 0x240   : > { %3749 = vmatprep.subr.mxu1 %v907_v19 }
 0x241   : > { %3750 = vmatpush3.msra.mxu1 %v907_v19  ;;  %v1322_v19 = vld [vmem:[#allocation8 + $0x218] sm:$0xff] }
 0x242   : > { %3751 = vmatprep.subr.mxu1 %v906_v20 }
 0x243   : > { %3752 = vmatpush3.msra.mxu1 %v906_v20  ;;  %v1321_v20 = vld [vmem:[#allocation8 + $0x210] sm:$0xff] }
 0x244   : > { %3753 = vmatprep.subr.mxu1 %v905_v21 }
 0x245   : > { %3754 = vmatpush3.msra.mxu1 %v905_v21  ;;  %v1320_v21 = vld [vmem:[#allocation8 + $0x208] sm:$0xff] }
 0x246   : > { %3755 = vmatprep.subr.mxu1 %v904_v22 }
 0x247   : > { %3756 = vmatpush3.msra.mxu1 %v904_v22  ;;  %v1319_v22 = vld [vmem:[#allocation8 + $0x200] sm:$0xff] }
 0x248   : > { %3757 = vmatprep.subr.mxu1 %v903_v23 }
 0x249   : > { %3758 = vmatpush3.msra.mxu1 %v903_v23  ;;  %v1351_v23 = vld [vmem:[#allocation8 + $0x2f8] sm:$0xff] }
 0x24a   : > { %3759 = vmatprep.subr.mxu1 %v902_v24 }
 0x24b   : > { %3760 = vmatpush3.msra.mxu1 %v902_v24  ;;  %v1350_v24 = vld [vmem:[#allocation8 + $0x2f0] sm:$0xff] }
 0x24c   : > { %3761 = vmatprep.subr.mxu1 %v901_v25 }
 0x24d   : > { %3762 = vmatpush3.msra.mxu1 %v901_v25  ;;  %v1349_v25 = vld [vmem:[#allocation8 + $0x2e8] sm:$0xff] }
 0x24e   : > { %3763 = vmatprep.subr.mxu1 %v900_v27 }
 0x24f   : > { %3764 = vmatpush3.msra.mxu1 %v900_v27  ;;  %v1347_v27 = vld [vmem:[#allocation8 + $0x2d8] sm:$0xff] }
 0x250   : > { %3765 = vmatprep.subr.mxu1 %v899_v29 }
 0x251   : > { %3766 = vmatpush3.msra.mxu1 %v899_v29  ;;  %v1345_v29 = vld [vmem:[#allocation8 + $0x2c8] sm:$0xff] }
 0x252   : > { %3767 = vmatprep.subr.mxu1 %v898_v30 }
 0x253   : > { %3768 = vmatpush3.msra.mxu1 %v898_v30  ;;  %v1344_v30 = vld [vmem:[#allocation8 + $0x2c0] sm:$0xff] }
 0x254   : > { %3769 = vmatprep.subr.mxu1 %v897_v31 }
 0x255   : > { %3770 = vmatpush3.msra.mxu1 %v897_v31  ;;  %v1343_v31 = vld [vmem:[#allocation8 + $0x2b8] sm:$0xff] }
 0x256   : > { %3823 = vmatprep.subr.mxu1 %v1317_v36 }
 0x2d2   : > { %v3661_v32 = vpop.f32.mrf.mxu1 }
 0x2d4   : > { %v980_v33 = vpop.f32.mrf.mxu1 }
 0x2d5   : > { %3736 = vmatprep.mubr.f32.mxu0 %v980_v33  ;;  %v1341_v33 = vld [vmem:[#allocation8 + $0x2a8] sm:$0xff] }
 0x2d6   : > { %v3668_v34 = vpop.f32.mrf.mxu1  ;;  %3737 = vmatmul.mubr.f32.vlgmr.msra.gmra.mxu0 %v3661_v32  ;;  %v1342_v32 = vld [vmem:[#allocation8 + $0x2b0] sm:$0xff] }
 0x2d7   : > { %3778 = vmatprep.mubr.msk.f32.mxu0 %vm446_vm0, %v4790_v5 }
 0x2d8   : > { %v1055_v35 = vpop.f32.mrf.mxu1 }
 0x2d9   : > { %3771 = vmatprep.mubr.f32.mxu1 %v1055_v35  ;;  %v1303_v35 = vld [vmem:[#allocation8 + $0x188] sm:$0xff] }
 0x2da   : > { %3772 = vmatmul.mubr.f32.vlgmr.msra.gmra.mxu1 %v3668_v34  ;;  %v1340_v34 = vld [vmem:[#allocation8 + $0x2a0] sm:$0xff] }
 0x2db   : > { %3824 = vmatpush3.msra.mxu1 %v1317_v36  ;;  %v1339_v36 = vld [vmem:[#allocation8 + $0x298] sm:$0xff] }
 0x2dc   : > { %3825 = vmatprep.subr.mxu1 %v1316_v37 }
 0x2dd   : > { %3826 = vmatpush3.msra.mxu1 %v1316_v37  ;;  %v1302_v37 = vld [vmem:[#allocation8 + $0x180] sm:$0xff] }
 0x2de   : > { %3827 = vmatprep.subr.mxu1 %v1315_v38 }
 0x2df   : > { %3828 = vmatpush3.msra.mxu1 %v1315_v38  ;;  %v1338_v38 = vld [vmem:[#allocation8 + $0x290] sm:$0xff] }
 0x2e0   : > { %3829 = vmatprep.subr.mxu1 %v1314_v39 }
 0x2e1   : > { %3830 = vmatpush3.msra.mxu1 %v1314_v39  ;;  %v1337_v39 = vld [vmem:[#allocation8 + $0x288] sm:$0xff] }
 0x2e2   : > { %3831 = vmatprep.subr.mxu1 %v1313_v40 }
 0x2e3   : > { %3832 = vmatpush3.msra.mxu1 %v1313_v40  ;;  %v1336_v40 = vld [vmem:[#allocation8 + $0x280] sm:$0xff] }
 0x2e4   : > { %3833 = vmatprep.subr.mxu1 %v1312_v41 }
 0x2e5   : > { %3834 = vmatpush3.msra.mxu1 %v1312_v41 }
 0x2e6   : > { %3835 = vmatprep.subr.mxu1 %v1311_v42 }
 0x2e7   : > { %3836 = vmatpush3.msra.mxu1 %v1311_v42 }
 0x2e8   : > { %3837 = vmatprep.subr.mxu1 %v1310_v43 }
 0x2e9   : > { %3838 = vmatpush3.msra.mxu1 %v1310_v43 }
 0x2ea   : > { %3839 = vmatprep.subr.mxu1 %v1309_v44 }
 0x2eb   : > { %3840 = vmatpush3.msra.mxu1 %v1309_v44 }
 0x2ec   : > { %3841 = vmatprep.subr.mxu1 %v1308_v45 }
 0x2ed   : > { %3842 = vmatpush3.msra.mxu1 %v1308_v45  ;;  %v1759_v45 = vld [vmem:[#allocation8 + $0x378] sm:$0xff] }
 0x2ee   : > { %3843 = vmatprep.subr.mxu1 %v1307_v46 }
 0x2ef   : > { %3844 = vmatpush3.msra.mxu1 %v1307_v46  ;;  %v1758_v46 = vld [vmem:[#allocation8 + $0x370] sm:$0xff] }
 0x2f0   : > { %3845 = vmatprep.subr.mxu1 %v1306_v47 }
 0x2f1   : > { %3846 = vmatpush3.msra.mxu1 %v1306_v47  ;;  %v1757_v47 = vld [vmem:[#allocation8 + $0x368] sm:$0xff] }
 0x2f2   : > { %3847 = vmatprep.subr.mxu1 %v1305_v48 }
 0x2f3   : > { %3848 = vmatpush3.msra.mxu1 %v1305_v48  ;;  %v1756_v48 = vld [vmem:[#allocation8 + $0x360] sm:$0xff] }
 0x2f4   : > { %3849 = vmatprep.subr.mxu1 %v1304_v49 }
 0x2f5   : > { %3850 = vmatpush3.msra.mxu1 %v1304_v49  ;;  %v1755_v49 = vld [vmem:[#allocation8 + $0x358] sm:$0xff] }
 0x2f6   : > { %v3703_v50 = vpop.f32.mrf.mxu1  ;;  %3851 = vmatprep.subr.mxu1 %v1303_v35 }
 0x2f7   : > { %3852 = vmatpush3.msra.mxu1 %v1303_v35  ;;  %v1788_v35 = vld [vmem:[#allocation8 + $0x450] sm:$0xff] }
 0x2f8   : > { %v1130_v52 = vpop.f32.mrf.mxu1  ;;  %3853 = vmatprep.subr.mxu1 %v1302_v37 }
 0x2f9   : > { %3854 = vmatpush3.msra.mxu1 %v1302_v37  ;;  %v1786_v37 = vld [vmem:[#allocation8 + $0x440] sm:$0xff] }
 0x396   : > { %v3738_v51 = vpop.f32.mrf.mxu0 }
 0x397   : > { %v1211_v54 = vadd.f32 %v3738_v51, %v3703_v50  ;;  %v1754_v50 = vld [vmem:[#allocation8 + $0x350] sm:$0xff]  ;;  %v1752_v51 = vld [vmem:[#allocation8 + $0x340] sm:$0xff] }
 0x398   : > { %v1205_v53 = vpop.f32.mrf.mxu0 }
 0x399   : > { %v1206_v59 = vadd.f32 %v1205_v53, %v1130_v52  ;;  %v1751_v52 = vld [vmem:[#allocation8 + $0x338] sm:$0xff]  ;;  %v1750_v53 = vld [vmem:[#allocation8 + $0x330] sm:$0xff] }
 0x39a   : > { %v3773_v58 = vpop.f32.mrf.mxu1 }
 0x39b   : > { %v1290_v60 = vadd.f32 %v3773_v58, %v1211_v54  ;;  %v1749_v54 = vld [vmem:[#allocation8 + $0x328] sm:$0xff]  ;;  %v1747_v58 = vld [vmem:[#allocation8 + $0x318] sm:$0xff] }
 0x39c   : > { %v1280_v61 = vpop.f32.mrf.mxu1 }
 0x39d   : > { %v1298_v62 = vadd.f32 %v3223_v56, %v1290_v60  ;;  %v1289_v63 = vadd.f32 %v1280_v61, %v1206_v59  ;;  %v1746_v59 = vld [vmem:[#allocation8 + $0x310] sm:$0xff] }
 0x39f   : > { %v4842_v0 = vmax.f32 %v1298_v62, 0.0  ;;  %v1297_v1 = vadd.f32 %v3223_v56, %v1289_v63  ;;  %v1748_v56 = vld [vmem:[#allocation8 + $0x320] sm:$0xff] }
 0x3a1   : > { %v1299_v2 = vmax.f32 %v1297_v1, 0.0  ;;  %3774 = vmatprep.subr.mxu0 %v4842_v0  ;;  %v3229_v1 = vld [vmem:[%s4990_s6 + $0x1] ss:$0 sm:$0xff] }
 0x3a2   : > { %3775 = vmatpush3.msra.mxu0 %v4842_v0 }
 0x3a3   : > { %3776 = vmatprep.subr.mxu0 %v1299_v2 }
 0x3a4   : > { %3777 = vmatpush3.msra.mxu0 %v1299_v2 }
 0x3a5   : > { %3779 = vmatmul.mubr.msk.f32.vlgmr.msra.gmra.mxu0 %vm446_vm0, %v4798_v7  ;;  %3781 = vmatprep.subr.mxu0 %v4842_v0 }
 0x3a6   : > { %3782 = vmatpush3.msra.mxu0 %v4842_v0  ;;  %3785 = vmatprep.mubr.msk.f32.mxu0 %vm446_vm0, %v4792_v6 }
 0x3a7   : > { %3783 = vmatprep.subr.mxu0 %v1299_v2 }
 0x3a8   : > { %3784 = vmatpush3.msra.mxu0 %v1299_v2 }
 0x3a9   : > { %3786 = vmatmul.mubr.msk.f32.vlgmr.msra.gmra.mxu0 %vm446_vm0, %v4800_v8  ;;  %3788 = vmatprep.subr.mxu0 %v1334_v3 }
 0x3aa   : > { %3789 = vmatpush3.msra.mxu0 %v1334_v3  ;;  %3820 = vmatprep.mubr.f32.mxu0 %v1299_v2 }
 0x3ab   : > { %3790 = vmatprep.subr.mxu0 %v1333_v4 }
 0x3ac   : > { %3791 = vmatpush3.msra.mxu0 %v1333_v4 }
 0x3ad   : > { %3792 = vmatprep.subr.mxu0 %v1332_v9 }
 0x3ae   : > { %3793 = vmatpush3.msra.mxu0 %v1332_v9 }
 0x3af   : > { %3794 = vmatprep.subr.mxu0 %v1331_v10 }
 0x3b0   : > { %3795 = vmatpush3.msra.mxu0 %v1331_v10 }
 0x3b1   : > { %3796 = vmatprep.subr.mxu0 %v1330_v11 }
 0x3b2   : > { %3797 = vmatpush3.msra.mxu0 %v1330_v11 }
 0x3b3   : > { %3798 = vmatprep.subr.mxu0 %v1329_v12 }
 0x3b4   : > { %3799 = vmatpush3.msra.mxu0 %v1329_v12 }
 0x3b5   : > { %3800 = vmatprep.subr.mxu0 %v1328_v13 }
 0x3b6   : > { %3801 = vmatpush3.msra.mxu0 %v1328_v13 }
 0x3b7   : > { %3802 = vmatprep.subr.mxu0 %v1327_v14 }
 0x3b8   : > { %3803 = vmatpush3.msra.mxu0 %v1327_v14 }
 0x3b9   : > { %3804 = vmatprep.subr.mxu0 %v1326_v15 }
 0x3ba   : > { %3805 = vmatpush3.msra.mxu0 %v1326_v15 }
 0x3bb   : > { %3806 = vmatprep.subr.mxu0 %v1325_v16 }
 0x3bc   : > { %3807 = vmatpush3.msra.mxu0 %v1325_v16 }
 0x3bd   : > { %3808 = vmatprep.subr.mxu0 %v1324_v17 }
 0x3be   : > { %3809 = vmatpush3.msra.mxu0 %v1324_v17  ;;  %v1776_v17 = vld [vmem:[#allocation8 + $0x3f8] sm:$0xff] }
 0x3bf   : > { %3810 = vmatprep.subr.mxu0 %v1323_v18 }
 0x3c0   : > { %3811 = vmatpush3.msra.mxu0 %v1323_v18  ;;  %v1775_v18 = vld [vmem:[#allocation8 + $0x3f0] sm:$0xff] }
 0x3c1   : > { %3812 = vmatprep.subr.mxu0 %v1322_v19 }
 0x3c2   : > { %3813 = vmatpush3.msra.mxu0 %v1322_v19  ;;  %v1773_v19 = vld [vmem:[#allocation8 + $0x3e0] sm:$0xff] }
 0x3c3   : > { %3814 = vmatprep.subr.mxu0 %v1321_v20 }
 0x3c4   : > { %3815 = vmatpush3.msra.mxu0 %v1321_v20  ;;  %v1771_v20 = vld [vmem:[#allocation8 + $0x3d0] sm:$0xff] }
 0x3c5   : > { %3816 = vmatprep.subr.mxu0 %v1320_v21 }
 0x3c6   : > { %3817 = vmatpush3.msra.mxu0 %v1320_v21  ;;  %v1770_v21 = vld [vmem:[#allocation8 + $0x3c8] sm:$0xff] }
 0x3c7   : > { %3818 = vmatprep.subr.mxu0 %v1319_v22 }
 0x3c8   : > { %3819 = vmatpush3.msra.mxu0 %v1319_v22  ;;  %v1768_v22 = vld [vmem:[#allocation8 + $0x3b8] sm:$0xff] }
 0x3c9   : > { %3821 = vmatmul.mubr.f32.vlgmr.msra.gmra.mxu0 %v4842_v0  ;;  %3858 = vmatprep.subr.mxu0 %v1351_v23 }
 0x3ca   : > { %3859 = vmatpush3.msra.mxu0 %v1351_v23  ;;  %v1767_v23 = vld [vmem:[#allocation8 + $0x3b0] sm:$0xff] }
 0x3cb   : > { %3860 = vmatprep.subr.mxu0 %v1350_v24 }
 0x3cc   : > { %3861 = vmatpush3.msra.mxu0 %v1350_v24  ;;  %v1766_v24 = vld [vmem:[#allocation8 + $0x3a8] sm:$0xff] }
 0x3cd   : > { %3862 = vmatprep.subr.mxu0 %v1349_v25 }
 0x3ce   : > { %3863 = vmatpush3.msra.mxu0 %v1349_v25  ;;  %v1765_v25 = vld [vmem:[#allocation8 + $0x3a0] sm:$0xff] }
 0x3cf   : > { %3864 = vmatprep.subr.mxu0 %v1348_v26 }
 0x3d0   : > { %3865 = vmatpush3.msra.mxu0 %v1348_v26  ;;  %v1764_v26 = vld [vmem:[#allocation8 + $0x398] sm:$0xff] }
 0x3d1   : > { %3866 = vmatprep.subr.mxu0 %v1347_v27 }
 0x3d2   : > { %3867 = vmatpush3.msra.mxu0 %v1347_v27  ;;  %v1763_v27 = vld [vmem:[#allocation8 + $0x390] sm:$0xff] }
 0x3d3   : > { %3868 = vmatprep.subr.mxu0 %v1346_v28 }
 0x3d4   : > { %3869 = vmatpush3.msra.mxu0 %v1346_v28  ;;  %v1762_v28 = vld [vmem:[#allocation8 + $0x388] sm:$0xff] }
 0x3d5   : > { %3870 = vmatprep.subr.mxu0 %v1345_v29 }
 0x3d6   : > { %3871 = vmatpush3.msra.mxu0 %v1345_v29  ;;  %v1761_v29 = vld [vmem:[#allocation8 + $0x380] sm:$0xff] }
 0x3d7   : > { %3872 = vmatprep.subr.mxu0 %v1344_v30 }
 0x3d8   : > { %3873 = vmatpush3.msra.mxu0 %v1344_v30  ;;  %v1793_v30 = vld [vmem:[#allocation8 + $0x478] sm:$0xff] }
 0x3d9   : > { %3874 = vmatprep.subr.mxu0 %v1343_v31 }
 0x3da   : > { %3875 = vmatpush3.msra.mxu0 %v1343_v31  ;;  %v1792_v31 = vld [vmem:[#allocation8 + $0x470] sm:$0xff] }
 0x3db   : > { %3876 = vmatprep.subr.mxu0 %v1342_v32 }
 0x3dc   : > { %3877 = vmatpush3.msra.mxu0 %v1342_v32  ;;  %v1791_v32 = vld [vmem:[#allocation8 + $0x468] sm:$0xff] }
 0x3dd   : > { %3878 = vmatprep.subr.mxu0 %v1341_v33 }
 0x3de   : > { %3879 = vmatpush3.msra.mxu0 %v1341_v33  ;;  %v1790_v33 = vld [vmem:[#allocation8 + $0x460] sm:$0xff] }
 0x3df   : > { %3880 = vmatprep.subr.mxu0 %v1340_v34 }
 0x3e0   : > { %3881 = vmatpush3.msra.mxu0 %v1340_v34  ;;  %v1789_v34 = vld [vmem:[#allocation8 + $0x458] sm:$0xff] }
 0x3e1   : > { %3882 = vmatprep.subr.mxu0 %v1339_v36 }
 0x3e2   : > { %3883 = vmatpush3.msra.mxu0 %v1339_v36  ;;  %v1787_v36 = vld [vmem:[#allocation8 + $0x448] sm:$0xff] }
 0x3e3   : > { %3884 = vmatprep.subr.mxu0 %v1338_v38 }
 0x3e4   : > { %3885 = vmatpush3.msra.mxu0 %v1338_v38  ;;  %v1785_v38 = vld [vmem:[#allocation8 + $0x438] sm:$0xff] }
 0x3e5   : > { %3886 = vmatprep.subr.mxu0 %v1337_v39 }
 0x3e6   : > { %3887 = vmatpush3.msra.mxu0 %v1337_v39  ;;  %v1784_v39 = vld [vmem:[#allocation8 + $0x430] sm:$0xff] }
 0x3e7   : > { %3888 = vmatprep.subr.mxu0 %v1336_v40 }
 0x3e8   : > { %3889 = vmatpush3.msra.mxu0 %v1336_v40  ;;  %v1783_v40 = vld [vmem:[#allocation8 + $0x428] sm:$0xff] }
 0x3e9   : > { %3942 = vmatprep.subr.mxu0 %v1759_v45 }
 0x465   : > { %v3780_v41 = vpop.f32.mrf.mxu0 }
 0x467   : > { %v1420_v42 = vpop.f32.mrf.mxu0 }
 0x468   : > { %3855 = vmatprep.mubr.f32.mxu1 %v1420_v42  ;;  %v1745_v42 = vld [vmem:[#allocation8 + $0x308] sm:$0xff] }
 0x469   : > { %v3787_v43 = vpop.f32.mrf.mxu0  ;;  %3856 = vmatmul.mubr.f32.vlgmr.msra.gmra.mxu1 %v3780_v41  ;;  %v1782_v41 = vld [vmem:[#allocation8 + $0x420] sm:$0xff] }
 0x46a   : > { %3897 = vmatprep.mubr.msk.f32.mxu1 %vm446_vm0, %v4790_v5  ;;  %v1753_v5 = vld [vmem:[#allocation8 + $0x348] sm:$0xff] }
 0x46b   : > { %v1495_v44 = vpop.f32.mrf.mxu0 }
 0x46c   : > { %3890 = vmatprep.mubr.f32.mxu0 %v1495_v44  ;;  %v1744_v44 = vld [vmem:[#allocation8 + $0x300] sm:$0xff] }
 0x46d   : > { %3891 = vmatmul.mubr.f32.vlgmr.msra.gmra.mxu0 %v3787_v43  ;;  %v1781_v43 = vld [vmem:[#allocation8 + $0x418] sm:$0xff] }
 0x46e   : > { %3943 = vmatpush3.msra.mxu0 %v1759_v45  ;;  %v1780_v45 = vld [vmem:[#allocation8 + $0x410] sm:$0xff] }
 0x46f   : > { %3944 = vmatprep.subr.mxu0 %v1758_v46 }
 0x470   : > { %3945 = vmatpush3.msra.mxu0 %v1758_v46  ;;  %v1779_v46 = vld [vmem:[#allocation8 + $0x408] sm:$0xff] }
 0x471   : > { %3946 = vmatprep.subr.mxu0 %v1757_v47 }
 0x472   : > { %3947 = vmatpush3.msra.mxu0 %v1757_v47  ;;  %v1778_v47 = vld [vmem:[#allocation8 + $0x400] sm:$0xff] }
 0x473   : > { %3948 = vmatprep.subr.mxu0 %v1756_v48 }
 0x474   : > { %3949 = vmatpush3.msra.mxu0 %v1756_v48 }
 0x475   : > { %3950 = vmatprep.subr.mxu0 %v1755_v49 }
 0x476   : > { %3951 = vmatpush3.msra.mxu0 %v1755_v49 }
 0x477   : > { %3952 = vmatprep.subr.mxu0 %v1754_v50 }
 0x478   : > { %3953 = vmatpush3.msra.mxu0 %v1754_v50 }
 0x479   : > { %3954 = vmatprep.subr.mxu0 %v1753_v5 }
 0x47a   : > { %3955 = vmatpush3.msra.mxu0 %v1753_v5  ;;  %v4882_v5 = vld [vmem:[#allocation5] sm:$0xff] }
 0x47b   : > { %3956 = vmatprep.subr.mxu0 %v1752_v51 }
 0x47c   : > { %3957 = vmatpush3.msra.mxu0 %v1752_v51 }
 0x47d   : > { %3958 = vmatprep.subr.mxu0 %v1751_v52 }
 0x47e   : > { %3959 = vmatpush3.msra.mxu0 %v1751_v52  ;;  %v2199_v52 = vld [vmem:[#allocation8 + $0x4f8] sm:$0xff] }
 0x47f   : > { %3960 = vmatprep.subr.mxu0 %v1750_v53 }
 0x480   : > { %3961 = vmatpush3.msra.mxu0 %v1750_v53  ;;  %v2198_v53 = vld [vmem:[#allocation8 + $0x4f0] sm:$0xff] }
 0x481   : > { %3962 = vmatprep.subr.mxu0 %v1749_v54 }
 0x482   : > { %3963 = vmatpush3.msra.mxu0 %v1749_v54  ;;  %v2197_v54 = vld [vmem:[#allocation8 + $0x4e8] sm:$0xff] }
 0x483   : > { %3964 = vmatprep.subr.mxu0 %v1748_v56 }
 0x484   : > { %3965 = vmatpush3.msra.mxu0 %v1748_v56  ;;  %v2196_v56 = vld [vmem:[#allocation8 + $0x4e0] sm:$0xff] }
 0x485   : > { %3966 = vmatprep.subr.mxu0 %v1747_v58 }
 0x486   : > { %3967 = vmatpush3.msra.mxu0 %v1747_v58  ;;  %v2195_v58 = vld [vmem:[#allocation8 + $0x4d8] sm:$0xff] }
 0x487   : > { %3968 = vmatprep.subr.mxu0 %v1746_v59 }
 0x488   : > { %3969 = vmatpush3.msra.mxu0 %v1746_v59  ;;  %v2194_v59 = vld [vmem:[#allocation8 + $0x4d0] sm:$0xff] }
 0x489   : > { %v3822_v60 = vpop.f32.mrf.mxu0  ;;  %3970 = vmatprep.subr.mxu0 %v1745_v42 }
 0x48a   : > { %3971 = vmatpush3.msra.mxu0 %v1745_v42  ;;  %v2232_v42 = vld [vmem:[#allocation8 + $0x5f0] sm:$0xff] }
 0x48b   : > { %v1570_v62 = vpop.f32.mrf.mxu0  ;;  %3972 = vmatprep.subr.mxu0 %v1744_v44 }
 0x48c   : > { %3973 = vmatpush3.msra.mxu0 %v1744_v44  ;;  %v2230_v44 = vld [vmem:[#allocation8 + $0x5e0] sm:$0xff] }
 0x529   : > { %v3857_v61 = vpop.f32.mrf.mxu1 }
 0x52a   : > { %v1651_v0 = vadd.f32 %v3857_v61, %v3822_v60  ;;  %v2193_v60 = vld [vmem:[#allocation8 + $0x4c8] sm:$0xff]  ;;  %v2192_v61 = vld [vmem:[#allocation8 + $0x4c0] sm:$0xff] }
 0x52b   : > { %v1645_v63 = vpop.f32.mrf.mxu1 }
 0x52c   : > { %v1646_v3 = vadd.f32 %v1645_v63, %v1570_v62  ;;  %v2191_v62 = vld [vmem:[#allocation8 + $0x4b8] sm:$0xff]  ;;  %v2190_v63 = vld [vmem:[#allocation8 + $0x4b0] sm:$0xff] }
 0x52d   : > { %v3892_v2 = vpop.f32.mrf.mxu0 }
 0x52e   : > { %v1730_v4 = vadd.f32 %v3892_v2, %v1651_v0  ;;  %v2189_v0 = vld [vmem:[#allocation8 + $0x4a8] sm:$0xff]  ;;  %v2187_v2 = vld [vmem:[#allocation8 + $0x498] sm:$0xff] }
 0x52f   : > { %v1720_v9 = vpop.f32.mrf.mxu0 }
 0x530   : > { %v1738_v10 = vadd.f32 %v3229_v1, %v1730_v4  ;;  %v1729_v11 = vadd.f32 %v1720_v9, %v1646_v3  ;;  %v2186_v3 = vld [vmem:[#allocation8 + $0x490] sm:$0xff] }
 0x532   : > { %v1740_v12 = vmul.f32 0.1, %v1738_v10  ;;  %v1737_v13 = vadd.f32 %v3229_v1, %v1729_v11  ;;  %v2188_v1 = vld [vmem:[#allocation8 + $0x4a0] sm:$0xff] }
 0x534   : > { %v4861_v14 = vadd.f32 %v1740_v12, %v4817_v55  ;;  %v1739_v15 = vmul.f32 0.1, %v1737_v13  ;;  %v3235_v13 = vld [vmem:[%s4990_s6 + $0x2] ss:$0 sm:$0xff] }
 0x536   : > { %v4864_v16 = vadd.f32 %v1739_v15, %v4819_v57  ;;  %3893 = vmatprep.subr.mxu1 %v4861_v14 }
 0x537   : > { %3894 = vmatpush3.msra.mxu1 %v4861_v14 }
 0x538   : > { %3895 = vmatprep.subr.mxu1 %v4864_v16 }
 0x539   : > { %3896 = vmatpush3.msra.mxu1 %v4864_v16 }
 0x53a   : > { %3898 = vmatmul.mubr.msk.f32.vlgmr.msra.gmra.mxu1 %vm446_vm0, %v4798_v7  ;;  %3900 = vmatprep.subr.mxu1 %v4861_v14  ;;  %v1774_v7 = vld [vmem:[#allocation8 + $0x3e8] sm:$0xff] }
 0x53b   : > { %3901 = vmatpush3.msra.mxu1 %v4861_v14  ;;  %3904 = vmatprep.mubr.msk.f32.mxu1 %vm446_vm0, %v4792_v6  ;;  %v1772_v6 = vld [vmem:[#allocation8 + $0x3d8] sm:$0xff] }
 0x53c   : > { %3902 = vmatprep.subr.mxu1 %v4864_v16 }
 0x53d   : > { %3903 = vmatpush3.msra.mxu1 %v4864_v16 }
 0x53e   : > { %3905 = vmatmul.mubr.msk.f32.vlgmr.msra.gmra.mxu1 %vm446_vm0, %v4800_v8  ;;  %3907 = vmatprep.subr.mxu1 %v1776_v17  ;;  %v1769_v8 = vld [vmem:[#allocation8 + $0x3c0] sm:$0xff] }
 0x53f   : > { %3908 = vmatpush3.msra.mxu1 %v1776_v17  ;;  %3939 = vmatprep.mubr.f32.mxu1 %v4864_v16 }
 0x540   : > { %3909 = vmatprep.subr.mxu1 %v1775_v18 }
 0x541   : > { %3910 = vmatpush3.msra.mxu1 %v1775_v18 }
 0x542   : > { %3911 = vmatprep.subr.mxu1 %v1774_v7 }
 0x543   : > { %3912 = vmatpush3.msra.mxu1 %v1774_v7 }
 0x544   : > { %3913 = vmatprep.subr.mxu1 %v1773_v19 }
 0x545   : > { %3914 = vmatpush3.msra.mxu1 %v1773_v19 }
 0x546   : > { %3915 = vmatprep.subr.mxu1 %v1772_v6 }
 0x547   : > { %3916 = vmatpush3.msra.mxu1 %v1772_v6 }
 0x548   : > { %3917 = vmatprep.subr.mxu1 %v1771_v20 }
 0x549   : > { %3918 = vmatpush3.msra.mxu1 %v1771_v20 }
 0x54a   : > { %3919 = vmatprep.subr.mxu1 %v1770_v21 }
 0x54b   : > { %3920 = vmatpush3.msra.mxu1 %v1770_v21 }
 0x54c   : > { %3921 = vmatprep.subr.mxu1 %v1769_v8 }
 0x54d   : > { %3922 = vmatpush3.msra.mxu1 %v1769_v8 }
 0x54e   : > { %3923 = vmatprep.subr.mxu1 %v1768_v22 }
 0x54f   : > { %3924 = vmatpush3.msra.mxu1 %v1768_v22  ;;  %v4893_v22 = vld [vmem:[#allocation5 + $0x8] sm:$0xff] }
 0x550   : > { %3925 = vmatprep.subr.mxu1 %v1767_v23 }
 0x551   : > { %3926 = vmatpush3.msra.mxu1 %v1767_v23  ;;  %v4899_v23 = vld [vmem:[#allocation5 + $0x10] sm:$0xff] }
 0x552   : > { %3927 = vmatprep.subr.mxu1 %v1766_v24 }
 0x553   : > { %3928 = vmatpush3.msra.mxu1 %v1766_v24  ;;  %v2216_v24 = vld [vmem:[#allocation8 + $0x578] sm:$0xff] }
 0x554   : > { %3929 = vmatprep.subr.mxu1 %v1765_v25 }
 0x555   : > { %3930 = vmatpush3.msra.mxu1 %v1765_v25  ;;  %v2215_v25 = vld [vmem:[#allocation8 + $0x570] sm:$0xff] }
 0x556   : > { %3931 = vmatprep.subr.mxu1 %v1764_v26 }
 0x557   : > { %3932 = vmatpush3.msra.mxu1 %v1764_v26  ;;  %v4903_v26 = vld [vmem:[#allocation5 + $0x18] sm:$0xff] }
 0x558   : > { %3933 = vmatprep.subr.mxu1 %v1763_v27 }
 0x559   : > { %3934 = vmatpush3.msra.mxu1 %v1763_v27  ;;  %v2214_v27 = vld [vmem:[#allocation8 + $0x568] sm:$0xff] }
 0x55a   : > { %3935 = vmatprep.subr.mxu1 %v1762_v28 }
 0x55b   : > { %3936 = vmatpush3.msra.mxu1 %v1762_v28  ;;  %v2213_v28 = vld [vmem:[#allocation8 + $0x560] sm:$0xff] }
 0x55c   : > { %3937 = vmatprep.subr.mxu1 %v1761_v29 }
 0x55d   : > { %3938 = vmatpush3.msra.mxu1 %v1761_v29  ;;  %v2212_v29 = vld [vmem:[#allocation8 + $0x558] sm:$0xff] }
 0x55e   : > { %3940 = vmatmul.mubr.f32.vlgmr.msra.gmra.mxu1 %v4861_v14  ;;  %3977 = vmatprep.subr.mxu1 %v1793_v30 }
 0x55f   : > { %3978 = vmatpush3.msra.mxu1 %v1793_v30  ;;  %v2211_v30 = vld [vmem:[#allocation8 + $0x550] sm:$0xff] }
 0x560   : > { %3979 = vmatprep.subr.mxu1 %v1792_v31 }
 0x561   : > { %3980 = vmatpush3.msra.mxu1 %v1792_v31  ;;  %v2210_v31 = vld [vmem:[#allocation8 + $0x548] sm:$0xff] }
 0x562   : > { %3981 = vmatprep.subr.mxu1 %v1791_v32 }
 0x563   : > { %3982 = vmatpush3.msra.mxu1 %v1791_v32  ;;  %v2209_v32 = vld [vmem:[#allocation8 + $0x540] sm:$0xff] }
 0x564   : > { %3983 = vmatprep.subr.mxu1 %v1790_v33 }
 0x565   : > { %3984 = vmatpush3.msra.mxu1 %v1790_v33  ;;  %v2208_v33 = vld [vmem:[#allocation8 + $0x538] sm:$0xff] }
 0x566   : > { %3985 = vmatprep.subr.mxu1 %v1789_v34 }
 0x567   : > { %3986 = vmatpush3.msra.mxu1 %v1789_v34  ;;  %v2207_v34 = vld [vmem:[#allocation8 + $0x530] sm:$0xff] }
 0x568   : > { %3987 = vmatprep.subr.mxu1 %v1788_v35 }
 0x569   : > { %3988 = vmatpush3.msra.mxu1 %v1788_v35  ;;  %v2206_v35 = vld [vmem:[#allocation8 + $0x528] sm:$0xff] }
 0x56a   : > { %3989 = vmatprep.subr.mxu1 %v1787_v36 }
 0x56b   : > { %3990 = vmatpush3.msra.mxu1 %v1787_v36  ;;  %v2205_v36 = vld [vmem:[#allocation8 + $0x520] sm:$0xff] }
 0x56c   : > { %3991 = vmatprep.subr.mxu1 %v1786_v37 }
 0x56d   : > { %3992 = vmatpush3.msra.mxu1 %v1786_v37  ;;  %v2204_v37 = vld [vmem:[#allocation8 + $0x518] sm:$0xff] }
 0x56e   : > { %3993 = vmatprep.subr.mxu1 %v1785_v38 }
 0x56f   : > { %3994 = vmatpush3.msra.mxu1 %v1785_v38  ;;  %v2203_v38 = vld [vmem:[#allocation8 + $0x510] sm:$0xff] }
 0x570   : > { %3995 = vmatprep.subr.mxu1 %v1784_v39 }
 0x571   : > { %3996 = vmatpush3.msra.mxu1 %v1784_v39  ;;  %v2202_v39 = vld [vmem:[#allocation8 + $0x508] sm:$0xff] }
 0x572   : > { %3997 = vmatprep.subr.mxu1 %v1783_v40 }
 0x573   : > { %3998 = vmatpush3.msra.mxu1 %v1783_v40  ;;  %v2201_v40 = vld [vmem:[#allocation8 + $0x500] sm:$0xff] }
 0x574   : > { %3999 = vmatprep.subr.mxu1 %v1782_v41 }
 0x575   : > { %4000 = vmatpush3.msra.mxu1 %v1782_v41  ;;  %v2233_v41 = vld [vmem:[#allocation8 + $0x5f8] sm:$0xff] }
 0x576   : > { %4001 = vmatprep.subr.mxu1 %v1781_v43 }
 0x577   : > { %4002 = vmatpush3.msra.mxu1 %v1781_v43  ;;  %v2231_v43 = vld [vmem:[#allocation8 + $0x5e8] sm:$0xff] }
 0x578   : > { %4003 = vmatprep.subr.mxu1 %v1780_v45 }
 0x579   : > { %4004 = vmatpush3.msra.mxu1 %v1780_v45  ;;  %v2229_v45 = vld [vmem:[#allocation8 + $0x5d8] sm:$0xff] }
 0x57a   : > { %4005 = vmatprep.subr.mxu1 %v1779_v46 }
 0x57b   : > { %4006 = vmatpush3.msra.mxu1 %v1779_v46  ;;  %v2228_v46 = vld [vmem:[#allocation8 + $0x5d0] sm:$0xff] }
 0x57c   : > { %4007 = vmatprep.subr.mxu1 %v1778_v47 }
 0x57d   : > { %4008 = vmatpush3.msra.mxu1 %v1778_v47  ;;  %v2227_v47 = vld [vmem:[#allocation8 + $0x5c8] sm:$0xff] }
 0x57e   : > { %4061 = vmatprep.subr.mxu1 %v2199_v52 }
 0x5fa   : > { %v3899_v48 = vpop.f32.mrf.mxu1 }
 0x5fc   : > { %v1862_v49 = vpop.f32.mrf.mxu1 }
 0x5fd   : > { %3974 = vmatprep.mubr.f32.mxu0 %v1862_v49  ;;  %v2225_v49 = vld [vmem:[#allocation8 + $0x5b8] sm:$0xff] }
 0x5fe   : > { %v3906_v50 = vpop.f32.mrf.mxu1  ;;  %3975 = vmatmul.mubr.f32.vlgmr.msra.gmra.mxu0 %v3899_v48  ;;  %v2226_v48 = vld [vmem:[#allocation8 + $0x5c0] sm:$0xff] }
 0x5ff   : > { %4016 = vmatprep.mubr.msk.f32.mxu0 %vm446_vm0, %v4882_v5 }
 0x600   : > { %v1937_v51 = vpop.f32.mrf.mxu1 }
 0x601   : > { %4009 = vmatprep.mubr.f32.mxu1 %v1937_v51  ;;  %v2223_v51 = vld [vmem:[#allocation8 + $0x5a8] sm:$0xff] }
 0x602   : > { %4010 = vmatmul.mubr.f32.vlgmr.msra.gmra.mxu1 %v3906_v50  ;;  %v2224_v50 = vld [vmem:[#allocation8 + $0x5b0] sm:$0xff] }
 0x603   : > { %4062 = vmatpush3.msra.mxu1 %v2199_v52  ;;  %v2222_v52 = vld [vmem:[#allocation8 + $0x5a0] sm:$0xff] }
 0x604   : > { %4063 = vmatprep.subr.mxu1 %v2198_v53 }
 0x605   : > { %4064 = vmatpush3.msra.mxu1 %v2198_v53  ;;  %v2185_v53 = vld [vmem:[#allocation8 + $0x488] sm:$0xff] }
 0x606   : > { %4065 = vmatprep.subr.mxu1 %v2197_v54 }
 0x607   : > { %4066 = vmatpush3.msra.mxu1 %v2197_v54  ;;  %v2221_v54 = vld [vmem:[#allocation8 + $0x598] sm:$0xff] }
 0x608   : > { %4067 = vmatprep.subr.mxu1 %v2196_v56 }
 0x609   : > { %4068 = vmatpush3.msra.mxu1 %v2196_v56  ;;  %v2184_v56 = vld [vmem:[#allocation8 + $0x480] sm:$0xff] }
 0x60a   : > { %4069 = vmatprep.subr.mxu1 %v2195_v58 }
 0x60b   : > { %4070 = vmatpush3.msra.mxu1 %v2195_v58  ;;  %v2220_v58 = vld [vmem:[#allocation8 + $0x590] sm:$0xff] }
 0x60c   : > { %4071 = vmatprep.subr.mxu1 %v2194_v59 }
 0x60d   : > { %4072 = vmatpush3.msra.mxu1 %v2194_v59  ;;  %v2219_v59 = vld [vmem:[#allocation8 + $0x588] sm:$0xff] }
 0x60e   : > { %4073 = vmatprep.subr.mxu1 %v2193_v60 }
 0x60f   : > { %4074 = vmatpush3.msra.mxu1 %v2193_v60  ;;  %v2218_v60 = vld [vmem:[#allocation8 + $0x580] sm:$0xff] }
 0x610   : > { %4075 = vmatprep.subr.mxu1 %v2192_v61 }
 0x611   : > { %4076 = vmatpush3.msra.mxu1 %v2192_v61 }
 0x612   : > { %4077 = vmatprep.subr.mxu1 %v2191_v62 }
 0x613   : > { %4078 = vmatpush3.msra.mxu1 %v2191_v62 }
 0x614   : > { %4079 = vmatprep.subr.mxu1 %v2190_v63 }
 0x615   : > { %4080 = vmatpush3.msra.mxu1 %v2190_v63 }
 0x616   : > { %4081 = vmatprep.subr.mxu1 %v2189_v0 }
 0x617   : > { %4082 = vmatpush3.msra.mxu1 %v2189_v0 }
 0x618   : > { %4083 = vmatprep.subr.mxu1 %v2188_v1 }
 0x619   : > { %4084 = vmatpush3.msra.mxu1 %v2188_v1  ;;  %v2640_v1 = vld [vmem:[#allocation10 + $0x78] sm:$0xff] }
 0x61a   : > { %4085 = vmatprep.subr.mxu1 %v2187_v2 }
 0x61b   : > { %4086 = vmatpush3.msra.mxu1 %v2187_v2  ;;  %v2639_v2 = vld [vmem:[#allocation10 + $0x70] sm:$0xff] }
 0x61c   : > { %4087 = vmatprep.subr.mxu1 %v2186_v3 }
 0x61d   : > { %4088 = vmatpush3.msra.mxu1 %v2186_v3  ;;  %v2638_v3 = vld [vmem:[#allocation10 + $0x68] sm:$0xff] }
 0x61e   : > { %v3941_v4 = vpop.f32.mrf.mxu1  ;;  %4089 = vmatprep.subr.mxu1 %v2185_v53 }
 0x61f   : > { %4090 = vmatpush3.msra.mxu1 %v2185_v53  ;;  %v2669_v53 = vld [vmem:[#allocation10 + $0x150] sm:$0xff] }
 0x620   : > { %v2012_v10 = vpop.f32.mrf.mxu1  ;;  %4091 = vmatprep.subr.mxu1 %v2184_v56 }
 0x621   : > { %4092 = vmatpush3.msra.mxu1 %v2184_v56  ;;  %v2667_v56 = vld [vmem:[#allocation10 + $0x140] sm:$0xff] }
 0x6be   : > { %v3976_v9 = vpop.f32.mrf.mxu0 }
 0x6bf   : > { %v2093_v12 = vadd.f32 %v3976_v9, %v3941_v4  ;;  %v2637_v4 = vld [vmem:[#allocation10 + $0x60] sm:$0xff]  ;;  %v2636_v9 = vld [vmem:[#allocation10 + $0x58] sm:$0xff] }
 0x6c0   : > { %v2087_v11 = vpop.f32.mrf.mxu0 }
 0x6c1   : > { %v2088_v17 = vadd.f32 %v2087_v11, %v2012_v10  ;;  %v2635_v10 = vld [vmem:[#allocation10 + $0x50] sm:$0xff]  ;;  %v2633_v11 = vld [vmem:[#allocation10 + $0x40] sm:$0xff] }
 0x6c2   : > { %v4011_v15 = vpop.f32.mrf.mxu1 }
 0x6c3   : > { %v2172_v18 = vadd.f32 %v4011_v15, %v2093_v12  ;;  %v2632_v12 = vld [vmem:[#allocation10 + $0x38] sm:$0xff]  ;;  %v2630_v15 = vld [vmem:[#allocation10 + $0x28] sm:$0xff] }
 0x6c4   : > { %v2162_v7 = vpop.f32.mrf.mxu1 }
 0x6c5   : > { %v2180_v19 = vadd.f32 %v3235_v13, %v2172_v18  ;;  %v2171_v6 = vadd.f32 %v2162_v7, %v2088_v17  ;;  %v2629_v17 = vld [vmem:[#allocation10 + $0x20] sm:$0xff]  ;;  %v2628_v18 = vld [vmem:[#allocation10 + $0x18] sm:$0xff]  ;;  %v2627_v7 = vld [vmem:[#allocation10 + $0x10] sm:$0xff] }
 0x6c7   : > { %v4889_v20 = vmax.f32 %v2180_v19, 0.0  ;;  %v2179_v21 = vadd.f32 %v3235_v13, %v2171_v6  ;;  %v2631_v13 = vld [vmem:[#allocation10 + $0x30] sm:$0xff] }
 0x6c9   : > { %v2181_v8 = vmax.f32 %v2179_v21, 0.0  ;;  %4012 = vmatprep.subr.mxu0 %v4889_v20 }
 0x6ca   : > { %4013 = vmatpush3.msra.mxu0 %v4889_v20 }
 0x6cb   : > { %4014 = vmatprep.subr.mxu0 %v2181_v8 }
 0x6cc   : > { %4015 = vmatpush3.msra.mxu0 %v2181_v8 }
 0x6cd   : > { %4017 = vmatmul.mubr.msk.f32.vlgmr.msra.gmra.mxu0 %vm446_vm0, %v4893_v22  ;;  %4019 = vmatprep.subr.mxu0 %v4889_v20 }
 0x6ce   : > { %4020 = vmatpush3.msra.mxu0 %v4889_v20  ;;  %4023 = vmatprep.mubr.msk.f32.mxu0 %vm446_vm0, %v4899_v23 }
 0x6cf   : > { %4021 = vmatprep.subr.mxu0 %v2181_v8 }
 0x6d0   : > { %4022 = vmatpush3.msra.mxu0 %v2181_v8 }
 0x6d1   : > { %4024 = vmatmul.mubr.msk.f32.vlgmr.msra.gmra.mxu0 %vm446_vm0, %v4903_v26  ;;  %4026 = vmatprep.subr.mxu0 %v2216_v24 }
 0x6d2   : > { %4027 = vmatpush3.msra.mxu0 %v2216_v24  ;;  %4058 = vmatprep.mubr.f32.mxu0 %v2181_v8  ;;  %v3241_v24 = vld [vmem:[%s4990_s6 + $0x3] ss:$0 sm:$0xff] }
 0x6d3   : > { %4028 = vmatprep.subr.mxu0 %v2215_v25 }
 0x6d4   : > { %4029 = vmatpush3.msra.mxu0 %v2215_v25 }
 0x6d5   : > { %4030 = vmatprep.subr.mxu0 %v2214_v27 }
 0x6d6   : > { %4031 = vmatpush3.msra.mxu0 %v2214_v27 }
 0x6d7   : > { %4032 = vmatprep.subr.mxu0 %v2213_v28 }
 0x6d8   : > { %4033 = vmatpush3.msra.mxu0 %v2213_v28 }
 0x6d9   : > { %4034 = vmatprep.subr.mxu0 %v2212_v29 }
 0x6da   : > { %4035 = vmatpush3.msra.mxu0 %v2212_v29 }
 0x6db   : > { %4036 = vmatprep.subr.mxu0 %v2211_v30 }
 0x6dc   : > { %4037 = vmatpush3.msra.mxu0 %v2211_v30 }
 0x6dd   : > { %4038 = vmatprep.subr.mxu0 %v2210_v31 }
 0x6de   : > { %4039 = vmatpush3.msra.mxu0 %v2210_v31 }
 0x6df   : > { %4040 = vmatprep.subr.mxu0 %v2209_v32 }
 0x6e0   : > { %4041 = vmatpush3.msra.mxu0 %v2209_v32 }
 0x6e1   : > { %4042 = vmatprep.subr.mxu0 %v2208_v33 }
 0x6e2   : > { %4043 = vmatpush3.msra.mxu0 %v2208_v33 }
 0x6e3   : > { %4044 = vmatprep.subr.mxu0 %v2207_v34 }
 0x6e4   : > { %4045 = vmatpush3.msra.mxu0 %v2207_v34 }
 0x6e5   : > { %4046 = vmatprep.subr.mxu0 %v2206_v35 }
 0x6e6   : > { %4047 = vmatpush3.msra.mxu0 %v2206_v35 }
 0x6e7   : > { %4048 = vmatprep.subr.mxu0 %v2205_v36 }
 0x6e8   : > { %4049 = vmatpush3.msra.mxu0 %v2205_v36 }
 0x6e9   : > { %4050 = vmatprep.subr.mxu0 %v2204_v37 }
 0x6ea   : > { %4051 = vmatpush3.msra.mxu0 %v2204_v37  ;;  %v2655_v37 = vld [vmem:[#allocation10 + $0xe8] sm:$0xff] }
 0x6eb   : > { %4052 = vmatprep.subr.mxu0 %v2203_v38 }
 0x6ec   : > { %4053 = vmatpush3.msra.mxu0 %v2203_v38  ;;  %v2653_v38 = vld [vmem:[#allocation10 + $0xd8] sm:$0xff] }
 0x6ed   : > { %4054 = vmatprep.subr.mxu0 %v2202_v39 }
 0x6ee   : > { %4055 = vmatpush3.msra.mxu0 %v2202_v39  ;;  %v2651_v39 = vld [vmem:[#allocation10 + $0xc8] sm:$0xff] }
 0x6ef   : > { %4056 = vmatprep.subr.mxu0 %v2201_v40 }
 0x6f0   : > { %4057 = vmatpush3.msra.mxu0 %v2201_v40  ;;  %v2650_v40 = vld [vmem:[#allocation10 + $0xc0] sm:$0xff] }
 0x6f1   : > { %4059 = vmatmul.mubr.f32.vlgmr.msra.gmra.mxu0 %v4889_v20  ;;  %4096 = vmatprep.subr.mxu0 %v2233_v41 }
 0x6f2   : > { %4097 = vmatpush3.msra.mxu0 %v2233_v41  ;;  %v2648_v41 = vld [vmem:[#allocation10 + $0xb0] sm:$0xff] }
 0x6f3   : > { %4098 = vmatprep.subr.mxu0 %v2232_v42 }
 0x6f4   : > { %4099 = vmatpush3.msra.mxu0 %v2232_v42  ;;  %v2647_v42 = vld [vmem:[#allocation10 + $0xa8] sm:$0xff] }
 0x6f5   : > { %4100 = vmatprep.subr.mxu0 %v2231_v43 }
 0x6f6   : > { %4101 = vmatpush3.msra.mxu0 %v2231_v43  ;;  %v2646_v43 = vld [vmem:[#allocation10 + $0xa0] sm:$0xff] }
 0x6f7   : > { %4102 = vmatprep.subr.mxu0 %v2230_v44 }
 0x6f8   : > { %4103 = vmatpush3.msra.mxu0 %v2230_v44  ;;  %v2645_v44 = vld [vmem:[#allocation10 + $0x98] sm:$0xff] }
 0x6f9   : > { %4104 = vmatprep.subr.mxu0 %v2229_v45 }
 0x6fa   : > { %4105 = vmatpush3.msra.mxu0 %v2229_v45  ;;  %v2644_v45 = vld [vmem:[#allocation10 + $0x90] sm:$0xff] }
 0x6fb   : > { %4106 = vmatprep.subr.mxu0 %v2228_v46 }
 0x6fc   : > { %4107 = vmatpush3.msra.mxu0 %v2228_v46  ;;  %v2643_v46 = vld [vmem:[#allocation10 + $0x88] sm:$0xff] }
 0x6fd   : > { %4108 = vmatprep.subr.mxu0 %v2227_v47 }
 0x6fe   : > { %4109 = vmatpush3.msra.mxu0 %v2227_v47  ;;  %v2642_v47 = vld [vmem:[#allocation10 + $0x80] sm:$0xff] }
 0x6ff   : > { %4110 = vmatprep.subr.mxu0 %v2226_v48 }
 0x700   : > { %4111 = vmatpush3.msra.mxu0 %v2226_v48  ;;  %v2674_v48 = vld [vmem:[#allocation10 + $0x178] sm:$0xff] }
 0x701   : > { %4112 = vmatprep.subr.mxu0 %v2225_v49 }
 0x702   : > { %4113 = vmatpush3.msra.mxu0 %v2225_v49  ;;  %v2673_v49 = vld [vmem:[#allocation10 + $0x170] sm:$0xff] }
 0x703   : > { %4114 = vmatprep.subr.mxu0 %v2224_v50 }
 0x704   : > { %4115 = vmatpush3.msra.mxu0 %v2224_v50  ;;  %v2672_v50 = vld [vmem:[#allocation10 + $0x168] sm:$0xff] }
 0x705   : > { %4116 = vmatprep.subr.mxu0 %v2223_v51 }
 0x706   : > { %4117 = vmatpush3.msra.mxu0 %v2223_v51  ;;  %v2671_v51 = vld [vmem:[#allocation10 + $0x160] sm:$0xff] }
 0x707   : > { %4118 = vmatprep.subr.mxu0 %v2222_v52 }
 0x708   : > { %4119 = vmatpush3.msra.mxu0 %v2222_v52  ;;  %v2670_v52 = vld [vmem:[#allocation10 + $0x158] sm:$0xff] }
 0x709   : > { %4120 = vmatprep.subr.mxu0 %v2221_v54 }
 0x70a   : > { %4121 = vmatpush3.msra.mxu0 %v2221_v54  ;;  %v2668_v54 = vld [vmem:[#allocation10 + $0x148] sm:$0xff] }
 0x70b   : > { %4122 = vmatprep.subr.mxu0 %v2220_v58 }
 0x70c   : > { %4123 = vmatpush3.msra.mxu0 %v2220_v58  ;;  %v2666_v58 = vld [vmem:[#allocation10 + $0x138] sm:$0xff] }
 0x70d   : > { %4124 = vmatprep.subr.mxu0 %v2219_v59 }
 0x70e   : > { %4125 = vmatpush3.msra.mxu0 %v2219_v59  ;;  %v2665_v59 = vld [vmem:[#allocation10 + $0x130] sm:$0xff] }
 0x70f   : > { %4126 = vmatprep.subr.mxu0 %v2218_v60 }
 0x710   : > { %4127 = vmatpush3.msra.mxu0 %v2218_v60  ;;  %v2664_v60 = vld [vmem:[#allocation10 + $0x128] sm:$0xff] }
 0x711   : > { %4180 = vmatprep.subr.mxu0 %v2640_v1 }
 0x78d   : > { %v4018_v61 = vpop.f32.mrf.mxu0 }
 0x78f   : > { %v2302_v62 = vpop.f32.mrf.mxu0 }
 0x790   : > { %4093 = vmatprep.mubr.f32.mxu1 %v2302_v62  ;;  %v2626_v62 = vld [vmem:[#allocation10 + $0x8] sm:$0xff] }
 0x791   : > { %v4025_v63 = vpop.f32.mrf.mxu0  ;;  %4094 = vmatmul.mubr.f32.vlgmr.msra.gmra.mxu1 %v4018_v61  ;;  %v2663_v61 = vld [vmem:[#allocation10 + $0x120] sm:$0xff] }
 0x792   : > { %4135 = vmatprep.mubr.msk.f32.mxu1 %vm446_vm0, %v4882_v5  ;;  %v2634_v5 = vld [vmem:[#allocation10 + $0x48] sm:$0xff] }
 0x793   : > { %v2377_v0 = vpop.f32.mrf.mxu0 }
 0x794   : > { %4128 = vmatprep.mubr.f32.mxu0 %v2377_v0  ;;  %v2625_v0 = vld [vmem:[#allocation10] sm:$0xff] }
 0x795   : > { %4129 = vmatmul.mubr.f32.vlgmr.msra.gmra.mxu0 %v4025_v63  ;;  %v2662_v63 = vld [vmem:[#allocation10 + $0x118] sm:$0xff] }
 0x796   : > { %4181 = vmatpush3.msra.mxu0 %v2640_v1  ;;  %v2661_v1 = vld [vmem:[#allocation10 + $0x110] sm:$0xff] }
 0x797   : > { %4182 = vmatprep.subr.mxu0 %v2639_v2 }
 0x798   : > { %4183 = vmatpush3.msra.mxu0 %v2639_v2  ;;  %v2660_v2 = vld [vmem:[#allocation10 + $0x108] sm:$0xff] }
 0x799   : > { %4184 = vmatprep.subr.mxu0 %v2638_v3 }
 0x79a   : > { %4185 = vmatpush3.msra.mxu0 %v2638_v3  ;;  %v2659_v3 = vld [vmem:[#allocation10 + $0x100] sm:$0xff] }
 0x79b   : > { %4186 = vmatprep.subr.mxu0 %v2637_v4 }
 0x79c   : > { %4187 = vmatpush3.msra.mxu0 %v2637_v4 }
 0x79d   : > { %4188 = vmatprep.subr.mxu0 %v2636_v9 }
 0x79e   : > { %4189 = vmatpush3.msra.mxu0 %v2636_v9 }
 0x79f   : > { %4190 = vmatprep.subr.mxu0 %v2635_v10 }
 0x7a0   : > { %4191 = vmatpush3.msra.mxu0 %v2635_v10 }
 0x7a1   : > { %4192 = vmatprep.subr.mxu0 %v2634_v5 }
 0x7a2   : > { %4193 = vmatpush3.msra.mxu0 %v2634_v5 }
 0x7a3   : > { %4194 = vmatprep.subr.mxu0 %v2633_v11 }
 0x7a4   : > { %4195 = vmatpush3.msra.mxu0 %v2633_v11 }
 0x7a5   : > { %4196 = vmatprep.subr.mxu0 %v2632_v12 }
 0x7a6   : > { %4197 = vmatpush3.msra.mxu0 %v2632_v12 }
 0x7a7   : > { %4198 = vmatprep.subr.mxu0 %v2631_v13 }
 0x7a8   : > { %4199 = vmatpush3.msra.mxu0 %v2631_v13 }
 0x7a9   : > { %4200 = vmatprep.subr.mxu0 %v2630_v15 }
 0x7aa   : > { %4201 = vmatpush3.msra.mxu0 %v2630_v15 }
 0x7ab   : > { %4202 = vmatprep.subr.mxu0 %v2629_v17 }
 0x7ac   : > { %4203 = vmatpush3.msra.mxu0 %v2629_v17 }
 0x7ad   : > { %4204 = vmatprep.subr.mxu0 %v2628_v18 }
 0x7ae   : > { %4205 = vmatpush3.msra.mxu0 %v2628_v18  ;;  %v3246_v18 = vld [vmem:[%s4992_s8] ss:$0 sm:$0xff] }
 0x7af   : > { %4206 = vmatprep.subr.mxu0 %v2627_v7 }
 0x7b0   : > { %4207 = vmatpush3.msra.mxu0 %v2627_v7 }
 0x7b1   : > { %v4060_v19 = vpop.f32.mrf.mxu0  ;;  %4208 = vmatprep.subr.mxu0 %v2626_v62 }
 0x7b2   : > { %4209 = vmatpush3.msra.mxu0 %v2626_v62 }
 0x7b3   : > { %v2452_v20 = vpop.f32.mrf.mxu0  ;;  %4210 = vmatprep.subr.mxu0 %v2625_v0 }
 0x7b4   : > { %4211 = vmatpush3.msra.mxu0 %v2625_v0 }
 0x851   : > { %v4095_v6 = vpop.f32.mrf.mxu1 }
 0x852   : > { %v2533_v8 = vadd.f32 %v4095_v6, %v4060_v19 }
 0x853   : > { %v2527_v21 = vpop.f32.mrf.mxu1 }
 0x854   : > { %v2528_v27 = vadd.f32 %v2527_v21, %v2452_v20 }
 0x855   : > { %v4130_v25 = vpop.f32.mrf.mxu0 }
 0x856   : > { %v2612_v28 = vadd.f32 %v4130_v25, %v2533_v8 }
 0x857   : > { %v2602_v29 = vpop.f32.mrf.mxu0 }
 0x858   : > { %v2620_v30 = vadd.f32 %v3241_v24, %v2612_v28  ;;  %v2611_v31 = vadd.f32 %v2602_v29, %v2528_v27 }
 0x85a   : > { %v2622_v32 = vmul.f32 0.1, %v2620_v30  ;;  %v2619_v33 = vadd.f32 %v3241_v24, %v2611_v31 }
 0x85c   : > { %v4914_v34 = vadd.f32 %v2622_v32, %v4861_v14  ;;  %v2621_v35 = vmul.f32 0.1, %v2619_v33  ;;  %v2657_v14 = vld [vmem:[#allocation10 + $0xf8] sm:$0xff] }
 0x85e   : > { %v2623_v36 = vadd.f32 %v2621_v35, %v4864_v16  ;;  %4131 = vmatprep.subr.mxu1 %v4914_v34  ;;  %v2656_v16 = vld [vmem:[#allocation10 + $0xf0] sm:$0xff] }
 0x85f   : > { %4132 = vmatpush3.msra.mxu1 %v4914_v34 }
 0x860   : > { %4133 = vmatprep.subr.mxu1 %v2623_v36 }
 0x861   : > { %4134 = vmatpush3.msra.mxu1 %v2623_v36 }
 0x862   : > { %4136 = vmatmul.mubr.msk.f32.vlgmr.msra.gmra.mxu1 %vm446_vm0, %v4893_v22  ;;  %4138 = vmatprep.subr.mxu1 %v4914_v34  ;;  %v2654_v22 = vld [vmem:[#allocation10 + $0xe0] sm:$0xff] }
 0x863   : > { %4139 = vmatpush3.msra.mxu1 %v4914_v34  ;;  %4142 = vmatprep.mubr.msk.f32.mxu1 %vm446_vm0, %v4899_v23  ;;  %v2652_v23 = vld [vmem:[#allocation10 + $0xd0] sm:$0xff] }
 0x864   : > { %4140 = vmatprep.subr.mxu1 %v2623_v36 }
 0x865   : > { %4141 = vmatpush3.msra.mxu1 %v2623_v36 }
 0x866   : > { %4143 = vmatmul.mubr.msk.f32.vlgmr.msra.gmra.mxu1 %vm446_vm0, %v4903_v26  ;;  %4145 = vmatprep.subr.mxu1 %v2657_v14  ;;  %v2649_v26 = vld [vmem:[#allocation10 + $0xb8] sm:$0xff] }
 0x867   : > { %4146 = vmatpush3.msra.mxu1 %v2657_v14  ;;  %4177 = vmatprep.mubr.f32.mxu1 %v2623_v36 }
 0x868   : > { %4147 = vmatprep.subr.mxu1 %v2656_v16 }
 0x869   : > { %4148 = vmatpush3.msra.mxu1 %v2656_v16 }
 0x86a   : > { %4149 = vmatprep.subr.mxu1 %v2655_v37 }
 0x86b   : > { %4150 = vmatpush3.msra.mxu1 %v2655_v37 }
 0x86c   : > { %4151 = vmatprep.subr.mxu1 %v2654_v22 }
 0x86d   : > { %4152 = vmatpush3.msra.mxu1 %v2654_v22 }
 0x86e   : > { %4153 = vmatprep.subr.mxu1 %v2653_v38 }
 0x86f   : > { %4154 = vmatpush3.msra.mxu1 %v2653_v38 }
 0x870   : > { %4155 = vmatprep.subr.mxu1 %v2652_v23 }
 0x871   : > { %4156 = vmatpush3.msra.mxu1 %v2652_v23 }
 0x872   : > { %4157 = vmatprep.subr.mxu1 %v2651_v39 }
 0x873   : > { %4158 = vmatpush3.msra.mxu1 %v2651_v39 }
 0x874   : > { %4159 = vmatprep.subr.mxu1 %v2650_v40 }
 0x875   : > { %4160 = vmatpush3.msra.mxu1 %v2650_v40 }
 0x876   : > { %4161 = vmatprep.subr.mxu1 %v2649_v26 }
 0x877   : > { %4162 = vmatpush3.msra.mxu1 %v2649_v26 }
 0x878   : > { %4163 = vmatprep.subr.mxu1 %v2648_v41 }
 0x879   : > { %4164 = vmatpush3.msra.mxu1 %v2648_v41 }
 0x87a   : > { %4165 = vmatprep.subr.mxu1 %v2647_v42 }
 0x87b   : > { %4166 = vmatpush3.msra.mxu1 %v2647_v42 }
 0x87c   : > { %4167 = vmatprep.subr.mxu1 %v2646_v43 }
 0x87d   : > { %4168 = vmatpush3.msra.mxu1 %v2646_v43 }
 0x87e   : > { %4169 = vmatprep.subr.mxu1 %v2645_v44 }
 0x87f   : > { %4170 = vmatpush3.msra.mxu1 %v2645_v44 }
 0x880   : > { %4171 = vmatprep.subr.mxu1 %v2644_v45 }
 0x881   : > { %4172 = vmatpush3.msra.mxu1 %v2644_v45 }
 0x882   : > { %4173 = vmatprep.subr.mxu1 %v2643_v46 }
 0x883   : > { %4174 = vmatpush3.msra.mxu1 %v2643_v46 }
 0x884   : > { %4175 = vmatprep.subr.mxu1 %v2642_v47 }
 0x885   : > { %4176 = vmatpush3.msra.mxu1 %v2642_v47 }
 0x886   : > { %4178 = vmatmul.mubr.f32.vlgmr.msra.gmra.mxu1 %v4914_v34  ;;  %4215 = vmatprep.subr.mxu1 %v2674_v48 }
 0x887   : > { %4216 = vmatpush3.msra.mxu1 %v2674_v48 }
 0x888   : > { %4217 = vmatprep.subr.mxu1 %v2673_v49 }
 0x889   : > { %4218 = vmatpush3.msra.mxu1 %v2673_v49 }
 0x88a   : > { %4219 = vmatprep.subr.mxu1 %v2672_v50 }
 0x88b   : > { %4220 = vmatpush3.msra.mxu1 %v2672_v50 }
 0x88c   : > { %4221 = vmatprep.subr.mxu1 %v2671_v51 }
 0x88d   : > { %4222 = vmatpush3.msra.mxu1 %v2671_v51 }
 0x88e   : > { %4223 = vmatprep.subr.mxu1 %v2670_v52 }
 0x88f   : > { %4224 = vmatpush3.msra.mxu1 %v2670_v52 }
 0x890   : > { %4225 = vmatprep.subr.mxu1 %v2669_v53 }
 0x891   : > { %4226 = vmatpush3.msra.mxu1 %v2669_v53 }
 0x892   : > { %4227 = vmatprep.subr.mxu1 %v2668_v54 }
 0x893   : > { %4228 = vmatpush3.msra.mxu1 %v2668_v54 }
 0x894   : > { %4229 = vmatprep.subr.mxu1 %v2667_v56 }
 0x895   : > { %4230 = vmatpush3.msra.mxu1 %v2667_v56 }
 0x896   : > { %4231 = vmatprep.subr.mxu1 %v2666_v58 }
 0x897   : > { %4232 = vmatpush3.msra.mxu1 %v2666_v58 }
 0x898   : > { %4233 = vmatprep.subr.mxu1 %v2665_v59 }
 0x899   : > { %4234 = vmatpush3.msra.mxu1 %v2665_v59 }
 0x89a   : > { %4235 = vmatprep.subr.mxu1 %v2664_v60 }
 0x89b   : > { %4236 = vmatpush3.msra.mxu1 %v2664_v60 }
 0x89c   : > { %4237 = vmatprep.subr.mxu1 %v2663_v61 }
 0x89d   : > { %4238 = vmatpush3.msra.mxu1 %v2663_v61 }
 0x89e   : > { %4239 = vmatprep.subr.mxu1 %v2662_v63 }
 0x89f   : > { %4240 = vmatpush3.msra.mxu1 %v2662_v63 }
 0x8a0   : > { %4241 = vmatprep.subr.mxu1 %v2661_v1 }
 0x8a1   : > { %4242 = vmatpush3.msra.mxu1 %v2661_v1 }
 0x8a2   : > { %4243 = vmatprep.subr.mxu1 %v2660_v2 }
 0x8a3   : > { %4244 = vmatpush3.msra.mxu1 %v2660_v2 }
 0x8a4   : > { %4245 = vmatprep.subr.mxu1 %v2659_v3 }
 0x8a5   : > { %4246 = vmatpush3.msra.mxu1 %v2659_v3 }
 0x922   : > { %v4137_v4 = vpop.f32.mrf.mxu1 }
 0x924   : > { %v2742_v9 = vpop.f32.mrf.mxu1 }
 0x925   : > { %4212 = vmatprep.mubr.f32.mxu0 %v2742_v9 }
 0x926   : > { %v4144_v10 = vpop.f32.mrf.mxu1  ;;  %4213 = vmatmul.mubr.f32.vlgmr.msra.gmra.mxu0 %v4137_v4 }
 0x928   : > { %v2817_v5 = vpop.f32.mrf.mxu1 }
 0x929   : > { %4247 = vmatprep.mubr.f32.mxu1 %v2817_v5 }
 0x92a   : > { %4248 = vmatmul.mubr.f32.vlgmr.msra.gmra.mxu1 %v4144_v10 }
 0x946   : > { %v4179_v11 = vpop.f32.mrf.mxu1 }
 0x948   : > { %v2892_v13 = vpop.f32.mrf.mxu1 }
 0x9e6   : > { %v4214_v12 = vpop.f32.mrf.mxu0 }
 0x9e7   : > { %v2973_v17 = vadd.f32 %v4214_v12, %v4179_v11 }
 0x9e8   : > { %v2967_v15 = vpop.f32.mrf.mxu0 }
 0x9e9   : > { %v2968_v19 = vadd.f32 %v2967_v15, %v2892_v13 }
 0x9ea   : > { %v4249_v7 = vpop.f32.mrf.mxu1 }
 0x9eb   : > { %v3052_v6 = vadd.f32 %v4249_v7, %v2973_v17 }
 0x9ec   : > { %v3042_v20 = vpop.f32.mrf.mxu1 }
 0x9ed   : > { %v3060_v21 = vadd.f32 %v3246_v18, %v3052_v6  ;;  %v3051_v8 = vadd.f32 %v3042_v20, %v2968_v19 }
 0x9ef   : > { %v3062_v24 = vadd.f32 %v3060_v21, %v4817_v55  ;;  %v3059_v25 = vadd.f32 %v3246_v18, %v3051_v8 }
 0x9f1   : > { %3064 = vst [vmem:[%s408_s26 + $0x8] sm:$0xff] %v3062_v24  ;;  %v3061_v27 = vadd.f32 %v3059_v25, %v4819_v57 }
 0x9f3   : > { %3063 = vst [vmem:[%s408_s26] sm:$0xff] %v3061_v27 }
 0x9f4   : > { %4490 = shalt.err (!%p4487_p5)
}
 0x9f5   : > { %s4491_s29 = scalar_lea.hbm %s4940_s21, 256  ;;  %s4495_s17 = scalar_lea.hbm %s4993_s9, 512 }
 0x9f6   : > { %p4492_p6 = scmp.ne.s32.totalorder %s4940_s21, %s4491_s29  ;;  %p4496_p9 = scmp.lt.s32.totalorder %s4940_s21, %s4993_s9 }
 0x9f7   : > { %p4497_p2 = scmp.lt.s32.totalorder %s4495_s17, %s4491_s29 }
 0x9f8   : > { %p4493_p4 = pnand %p4492_p6, %p5020_p12 }
 0x9f9   : > { %p4498_p3 = por %p4497_p2, %p4496_p9 }
 0x9fa   : > { %p4494_p8 = pneg %p4493_p4 }
 0x9fc   : > { %p4499_p10 = pnand %p4498_p3, %p4494_p8 }
 0x9fe   : > { %4502 = shalt.err (!%p4499_p10)
}
 0x9ff   : > { %s4559_s20 = smov 128   ;;  %s4560_s24 = smov 8  }
 0xa00   : > { %4268 = dma.vmem_to_hbm [thread:$0]  (%p5020_p12), %s4935_s15, 256, %s4940_s21, %s3066_s5, %s4559_s20, %s4559_s20, %s4560_s24  }
 0xa01 PF: > { %s3094_s25 = sand.u32 1, %s4537_s30   ;;  %p5021_p7 = scmp.ne.s32.totalorder %s5004_s16, 0 }
 0xa02   : > { %p5022_p1 = scmp.ge.s32.totalorder %s4549_s12, 2  ;;  %s3095_s13 = scalar_lea.sflag [#allocation4], %s3094_s25 }
 0xa04   : > { %p4288_p13 = pnand %p5022_p1, %p5021_p7 }
 0xa06   : > { %p4289_p0 = pneg %p4288_p13 }
 0xa08   : > { %4532 = dma.done.wait (%p4289_p0), %s3095_s13, 256  }
 0xa09   : > { %4534 = vsyncadd (%p4289_p0), %s3095_s13, 4294967040  ;;  %p24_p11 = scmp.ge.s32.totalorder %s4711_s18, 4   ;;  %s5023_s30 = smov %s4541_s10 }
 0xa0a   : > { %s5024_s10 = smov %s4545_s11  ;;  %s5025_s11 = smov %s4727_s23 }
 0xa0b   : > { %s5026_s12 = smov %s4711_s18  ;;  %26 = sbr.rel (!%p24_p11) target bundleno = 11 (0xb), region = 136 }
 0xa10   :  { %3100 = vsyncpa [#allocation3], 1 }
 0xa11   :  { %3102 = vsyncpa [#allocation3 + $0x1], 1 }
 0xa12   :  { %3103 = vsyncpa [#allocation6], 1 }
 0xa13   :  { %3104 = vsyncpa [#allocation9], 1 }
 0xa14   :  { %3105 = vsyncpa [#allocation4], 1 }
 0xa15   :  { %3107 = vsyncpa [#allocation4 + $0x1], 1 }

</bundles_post_ra>
